<compile_context>
chip_gen: v7x
topology: tpu7x:2x2x1
jax: 0.10.0
libtpu: 0.0.40
codegen_flags: <defaults>
</compile_context>

<pallas_src>
import math
import functools

import jax
import jax.numpy as jnp
from jax.experimental import pallas as pl
from jax.experimental.pallas import tpu as pltpu


def _round_up(x, m):
    return ((x + m - 1) // m) * m


def _default_grid_steps():
    """Target number of grid steps along the 'parallel' batch axis.

    Megacore chips (v4 / v5p / v7x) shard 'parallel' grid axes across their 2
    TensorCores, so aim for >= 2 steps there.  On single-TC chips (v5e / v6e)
    every extra step is ~0.35 us of pure pipeline overhead for this
    latency-bound MLP, so 1 step is best.
    """
    try:
        kind = jax.devices()[0].device_kind.lower()
    except Exception:
        return 1
    if "v5 lite" in kind or "v5e" in kind or "v6" in kind:
        return 1
    if any(tag in kind for tag in ("v7", "v4", "v5p")):
        return 2
    return 1


def _activation(x, act_func, approximate_gelu):
    if act_func == "gelu":
        if approximate_gelu:
            # tanh-approx GELU: tanh runs on the EUP (otherwise-idle VLIW slot),
            # whereas exact erf is a long VALU polynomial.
            return jax.nn.gelu(x, approximate=True)
        # exact erf GELU — matches torch.nn.GELU() default.
        return 0.5 * x * (1.0 + jax.lax.erf(x * jnp.float32(1.0 / math.sqrt(2.0))))
    if act_func == "relu":
        return jnp.maximum(x, jnp.float32(0.0))
    if act_func == "tanh":
        return jnp.tanh(x)
    raise NotImplementedError(act_func)


def _mlp_kernel(n_layers, compute_dtype, act_func, approximate_gelu, x_ref, *refs):
    """refs = (w1, b1, w2, b2, ..., wn, bn, out_ref); every tile lives in VMEM."""
    out_ref = refs[-1]
    h = x_ref[...]
    for k in range(n_layers):
        w = refs[2 * k][...]                          # (H_in, H_out), pre-transposed vs torch W
        b = refs[2 * k + 1][...].astype(jnp.float32)  # (1, H_out) -> broadcasts over batch rows
        lhs = h if h.dtype == compute_dtype else h.astype(compute_dtype)
        # MXU matmul with f32 accumulation; operands are f32 (exact path) or bf16
        # (v6e/v7x fast path when weights were pre-cast in prepare_ltam_params).
        h = jnp.dot(lhs, w, preferred_element_type=jnp.float32) + b
        # TODO(synk): nn.Dropout(p) is identity in eval mode; training-mode dropout
        # (pltpu.prng_seed / prng_random_bits masking per grid step) is intentionally omitted.
        h = _activation(h, act_func, approximate_gelu)
    out_ref[...] = jax.nn.sigmoid(h).astype(out_ref.dtype)


def prepare_ltam_params(weights, biases, *, weight_dtype=jnp.float32):
    """Parameter prep hoisted OUT of the forward; call once at model init.

    weights[k]: (H_k, H_{k+1})  (pre-transposed vs. the torch Linear weight)
    biases[k]:  (H_{k+1},)
    weight_dtype: pass jnp.bfloat16 on v6e/v7x for native MXU operand throughput once the
    problem leaves the latency-bound regime (accumulation stays f32); keep f32 for exact
    parity with the PyTorch reference.  Biases stay f32 so the bias add is done in the
    f32 accumulator.
    """
    params = []
    for w, b in zip(weights, biases):
        params.append(jnp.asarray(w, weight_dtype))
        params.append(jnp.asarray(b, jnp.float32).reshape(1, -1))
    return tuple(params)


def ltam_controller_v2(x, params, *, act_func="gelu", approximate_gelu=False,
                       grid_steps=None, max_block_b=1024):
    """Fused forward pass. x: (..., H0); params from prepare_ltam_params."""
    n_layers = len(params) // 2
    H0 = params[0].shape[0]
    H_out = params[-2].shape[1]
    compute_dtype = params[0].dtype  # MXU operand dtype == (pre-cast) weight dtype

    lead = x.shape[:-1]
    assert x.shape[-1] == H0, "input feature dim does not match first Linear"
    x2 = x.reshape(-1, H0)
    B = x2.shape[0]

    n_steps = _default_grid_steps() if grid_steps is None else max(1, int(grid_steps))
    # Batch tile: at least ceil(B / n_steps) so the 'parallel' axis has ~n_steps blocks
    # (shards across both TCs on megacore chips), rounded to the 8-row sublane tile,
    # capped so wide future configs stay inside scoped VMEM (v5e default 16 MiB).
    block_b = _round_up(pl.cdiv(B, n_steps), 8)
    block_b = min(block_b, _round_up(max_block_b, 8))
    B_pad = _round_up(B, block_b)
    grid = (B_pad // block_b,)

    x_pad = x2 if B_pad == B else jnp.pad(x2, ((0, B_pad - B), (0, 0)))

    # Advisory cost estimate in actually-transferred terms (padded batch, real dtypes).
    flops = 2 * B_pad * sum(int(params[2 * k].shape[0]) * int(params[2 * k].shape[1])
                            for k in range(n_layers))
    hidden_units = sum(int(params[2 * k].shape[1]) for k in range(n_layers))
    transcendentals = B_pad * H_out + (B_pad * hidden_units if act_func in ("gelu", "tanh") else 0)
    bytes_accessed = (x_pad.size * x_pad.dtype.itemsize
                      + B_pad * H_out * x.dtype.itemsize
                      + sum(int(p.size) * p.dtype.itemsize for p in params))

    kernel = functools.partial(_mlp_kernel, n_layers, compute_dtype, act_func, approximate_gelu)
    out_shape = jax.ShapeDtypeStruct((B_pad, H_out), x.dtype)

    def call(param_pipeline_mode):
        spec_kwargs = {} if param_pipeline_mode is None else {"pipeline_mode": param_pipeline_mode}
        # x / out: tile the batch only; the feature dims equal the full array dims
        # (legal block shapes), so no lane padding / HBM pad copies are needed.
        in_specs = [pl.BlockSpec((block_b, H0), lambda i: (i, 0))]
        for p in params:
            # Parameters are grid-invariant (constant index_map) -> single-buffer them.
            in_specs.append(pl.BlockSpec(p.shape, lambda i: (0, 0), **spec_kwargs))
        out_spec = pl.BlockSpec((block_b, H_out), lambda i: (i, 0))
        return pl.pallas_call(
            kernel,
            out_shape=out_shape,
            grid=grid,
            in_specs=in_specs,
            out_specs=out_spec,
            # Total VMEM footprint here is well under 1 MiB, safely inside the default
            # scoped limit on every generation (v5e 16 MiB / v6e 32 MiB / v7x 32 MiB).
            # Set vmem_limit_bytes explicitly if block_b or the hidden widths ever grow.
            compiler_params=pltpu.CompilerParams(dimension_semantics=("parallel",)),
            cost_estimate=pl.CostEstimate(flops=int(flops),
                                          transcendentals=int(transcendentals),
                                          bytes_accessed=int(bytes_accessed)),
        )(x_pad, *params)

    try:
        out_pad = call(pl.Buffered(1))
    except Exception:
        # pipeline_mode / single-buffering unsupported on this jax build; default
        # double-buffering is functionally identical (params are tiny anyway).
        out_pad = call(None)

    out = out_pad if B_pad == B else out_pad[:B]
    return out.reshape(*lead, H_out)


def _reference(x, params, act_func="gelu"):
    h = x
    n_layers = len(params) // 2
    for k in range(n_layers):
        w = params[2 * k].astype(jnp.float32)
        b = params[2 * k + 1].reshape(-1)
        h = jnp.dot(h, w) + b
        if act_func == "gelu":
            h = 0.5 * h * (1.0 + jax.lax.erf(h / jnp.sqrt(2.0)))
        elif act_func == "relu":
            h = jnp.maximum(h, 0.0)
        elif act_func == "tanh":
            h = jnp.tanh(h)
        # dropout: identity (eval)
    return jax.nn.sigmoid(h)


if __name__ == "__main__":
    hidden_sizes = [32, 64, 32]   # LTAMControllerV2(hidden_sizes=[32, 64, 32])
    B = 200                       # ragged-ish batch: exercises device-aware tiling

    key = jax.random.PRNGKey(0)
    n_layers = len(hidden_sizes) - 1
    k_x, *k_params = jax.random.split(key, 1 + 2 * n_layers)

    x = jax.random.normal(k_x, (B, hidden_sizes[0]), dtype=jnp.float32)

    # Deterministic PyTorch-Linear-style init (uniform(-1/sqrt(fan_in), 1/sqrt(fan_in))),
    # stored pre-transposed as (in, out).
    weights, biases = [], []
    for k in range(n_layers):
        fan_in, fan_out = hidden_sizes[k], hidden_sizes[k + 1]
        bound = 1.0 / math.sqrt(fan_in)
        w = jax.random.uniform(k_params[2 * k], (fan_in, fan_out),
                               minval=-bound, maxval=bound, dtype=jnp.float32)
        b = jax.random.uniform(k_params[2 * k + 1], (fan_out,),
                               minval=-bound, maxval=bound, dtype=jnp.float32)
        weights.append(w)
        biases.append(b)

    # One-time parameter prep (off the forward hot path).  Use weight_dtype=jnp.bfloat16
    # on v6e/v7x for the native-MXU operand path (looser tolerance then).
    params = prepare_ltam_params(weights, biases, weight_dtype=jnp.float32)

    y = ltam_controller_v2(x, params)           # device-aware grid (1 step v5e/v6e, 2 on megacore)
    jax.block_until_ready(y)

    y_ref = _reference(x, params)
    assert y.shape == y_ref.shape, "shape mismatch vs reference"
    assert jnp.allclose(y, y_ref, atol=1e-5, rtol=1e-5), "mismatch vs reference"

    print("KERNEL_OK")
</pallas_src>

<mosaic_0001>
module attributes {stable_mosaic.version = 11 : i64} {
  func.func @_mlp_kernel(%arg0: i32, %arg1: memref<200x32xf32, #tpu.memory_space<vmem>>, %arg2: memref<32x64xf32, #tpu.memory_space<vmem>>, %arg3: memref<1x64xf32, #tpu.memory_space<vmem>>, %arg4: memref<64x32xf32, #tpu.memory_space<vmem>>, %arg5: memref<1x32xf32, #tpu.memory_space<vmem>>, %arg6: memref<200x32xf32, #tpu.memory_space<vmem>>) attributes {dimension_semantics = [#tpu.dimension_semantics<parallel>], iteration_bounds = array<i64: 1>, scalar_prefetch = 0 : i64, scratch_operands = 0 : i64, tpu.core_type = #tpu.core_type<tc>, window_params = [{transform_indices = @transform_0, window_bounds = array<i64: 200, 32>}, {pipeline_mode = #tpu.pipeline_mode<synchronous>, transform_indices = @transform_1, window_bounds = array<i64: 32, 64>}, {pipeline_mode = #tpu.pipeline_mode<synchronous>, transform_indices = @transform_2, window_bounds = array<i64: 1, 64>}, {pipeline_mode = #tpu.pipeline_mode<synchronous>, transform_indices = @transform_3, window_bounds = array<i64: 64, 32>}, {pipeline_mode = #tpu.pipeline_mode<synchronous>, transform_indices = @transform_4, window_bounds = array<i64: 1, 32>}, {transform_indices = @transform_5, window_bounds = array<i64: 200, 32>}]} {
    %c0 = arith.constant 0 : index
    %c0_0 = arith.constant 0 : index
    %0 = vector.load %arg1[%c0, %c0_0] : memref<200x32xf32, #tpu.memory_space<vmem>>, vector<200x32xf32>
    %c0_1 = arith.constant 0 : index
    %c0_2 = arith.constant 0 : index
    %1 = vector.load %arg2[%c0_1, %c0_2] : memref<32x64xf32, #tpu.memory_space<vmem>>, vector<32x64xf32>
    %c0_3 = arith.constant 0 : index
    %c0_4 = arith.constant 0 : index
    %2 = vector.load %arg3[%c0_3, %c0_4] : memref<1x64xf32, #tpu.memory_space<vmem>>, vector<1x64xf32>
    %cst = arith.constant dense<0.000000e+00> : vector<200x64xf32>
    %3 = tpu.matmul %0, %1, %cst {dimension_numbers = #tpu.dot_dimension_numbers<[1], [0], [0], [1], [0, 0, 1, 1], [], []>} : vector<200x32xf32>, vector<32x64xf32>, vector<200x64xf32> -> vector<200x64xf32>
    %4 = vector.broadcast %2 : vector<1x64xf32> to vector<200x64xf32>
    %5 = arith.addf %3, %4 : vector<200x64xf32>
    %cst_5 = arith.constant 5.000000e-01 : f32
    %6 = vector.broadcast %cst_5 : f32 to vector<200x64xf32>
    %7 = arith.mulf %6, %5 : vector<200x64xf32>
    %cst_6 = arith.constant 0.707106769 : f32
    %8 = vector.broadcast %cst_6 : f32 to vector<200x64xf32>
    %9 = arith.mulf %5, %8 : vector<200x64xf32>
    %10 = math.erf %9 : vector<200x64xf32>
    %cst_7 = arith.constant 1.000000e+00 : f32
    %11 = vector.broadcast %cst_7 : f32 to vector<200x64xf32>
    %12 = arith.addf %11, %10 : vector<200x64xf32>
    %13 = arith.mulf %7, %12 : vector<200x64xf32>
    %c0_8 = arith.constant 0 : index
    %c0_9 = arith.constant 0 : index
    %14 = vector.load %arg4[%c0_8, %c0_9] : memref<64x32xf32, #tpu.memory_space<vmem>>, vector<64x32xf32>
    %c0_10 = arith.constant 0 : index
    %c0_11 = arith.constant 0 : index
    %15 = vector.load %arg5[%c0_10, %c0_11] : memref<1x32xf32, #tpu.memory_space<vmem>>, vector<1x32xf32>
    %cst_12 = arith.constant dense<0.000000e+00> : vector<200x32xf32>
    %16 = tpu.matmul %13, %14, %cst_12 {dimension_numbers = #tpu.dot_dimension_numbers<[1], [0], [0], [1], [0, 0, 1, 1], [], []>} : vector<200x64xf32>, vector<64x32xf32>, vector<200x32xf32> -> vector<200x32xf32>
    %17 = vector.broadcast %15 : vector<1x32xf32> to vector<200x32xf32>
    %18 = arith.addf %16, %17 : vector<200x32xf32>
    %cst_13 = arith.constant 5.000000e-01 : f32
    %19 = vector.broadcast %cst_13 : f32 to vector<200x32xf32>
    %20 = arith.mulf %19, %18 : vector<200x32xf32>
    %cst_14 = arith.constant 0.707106769 : f32
    %21 = vector.broadcast %cst_14 : f32 to vector<200x32xf32>
    %22 = arith.mulf %18, %21 : vector<200x32xf32>
    %23 = math.erf %22 : vector<200x32xf32>
    %cst_15 = arith.constant 1.000000e+00 : f32
    %24 = vector.broadcast %cst_15 : f32 to vector<200x32xf32>
    %25 = arith.addf %24, %23 : vector<200x32xf32>
    %26 = arith.mulf %20, %25 : vector<200x32xf32>
    %27 = arith.negf %26 : vector<200x32xf32>
    %28 = math.exp %27 : vector<200x32xf32>
    %cst_16 = arith.constant 1.000000e+00 : f32
    %29 = vector.broadcast %cst_16 : f32 to vector<200x32xf32>
    %30 = arith.addf %29, %28 : vector<200x32xf32>
    %31 = arith.divf %29, %30 : vector<200x32xf32>
    %c0_17 = arith.constant 0 : index
    %c0_18 = arith.constant 0 : index
    %32 = vector.load %arg6[%c0_17, %c0_18] : memref<200x32xf32, #tpu.memory_space<vmem>>, vector<200x32xf32>
    tpu.vector_store %arg6[%c0_17, %c0_18], %31 {strides = array<i32>} : memref<200x32xf32, #tpu.memory_space<vmem>>, vector<200x32xf32>,
    return
  }
  func.func @transform_0(%arg0: i32) -> (i32, i32) {
    %c0_i32 = arith.constant 0 : i32
    %c0_i32_0 = arith.constant 0 : i32
    return %arg0, %c0_i32 : i32, i32
  }
  func.func @transform_1(%arg0: i32) -> (i32, i32) {
    %c0_i32 = arith.constant 0 : i32
    %c0_i32_0 = arith.constant 0 : i32
    %c0_i32_1 = arith.constant 0 : i32
    return %c0_i32, %c0_i32_0 : i32, i32
  }
  func.func @transform_2(%arg0: i32) -> (i32, i32) {
    %c0_i32 = arith.constant 0 : i32
    %c0_i32_0 = arith.constant 0 : i32
    %c0_i32_1 = arith.constant 0 : i32
    return %c0_i32, %c0_i32_0 : i32, i32
  }
  func.func @transform_3(%arg0: i32) -> (i32, i32) {
    %c0_i32 = arith.constant 0 : i32
    %c0_i32_0 = arith.constant 0 : i32
    %c0_i32_1 = arith.constant 0 : i32
    return %c0_i32, %c0_i32_0 : i32, i32
  }
  func.func @transform_4(%arg0: i32) -> (i32, i32) {
    %c0_i32 = arith.constant 0 : i32
    %c0_i32_0 = arith.constant 0 : i32
    %c0_i32_1 = arith.constant 0 : i32
    return %c0_i32, %c0_i32_0 : i32, i32
  }
  func.func @transform_5(%arg0: i32) -> (i32, i32) {
    %c0_i32 = arith.constant 0 : i32
    %c0_i32_0 = arith.constant 0 : i32
    return %arg0, %c0_i32 : i32, i32
  }
}

module attributes {stable_mosaic.version = 11 : i64} {
  func.func @_mlp_kernel(%arg0: i32, %arg1: memref<200x32xf32, #tpu.memory_space<vmem>>, %arg2: memref<32x64xf32, #tpu.memory_space<vmem>>, %arg3: memref<1x64xf32, #tpu.memory_space<vmem>>, %arg4: memref<64x32xf32, #tpu.memory_space<vmem>>, %arg5: memref<1x32xf32, #tpu.memory_space<vmem>>, %arg6: memref<200x32xf32, #tpu.memory_space<vmem>>) attributes {dimension_semantics = [#tpu.dimension_semantics<parallel>], iteration_bounds = array<i64: 1>, scalar_prefetch = 0 : i64, scratch_operands = 0 : i64, tpu.core_type = #tpu.core_type<tc>, window_params = [{transform_indices = @transform_0, window_bounds = array<i64: 200, 32>}, {pipeline_mode = #tpu.pipeline_mode<synchronous>, transform_indices = @transform_1, window_bounds = array<i64: 32, 64>}, {pipeline_mode = #tpu.pipeline_mode<synchronous>, transform_indices = @transform_2, window_bounds = array<i64: 1, 64>}, {pipeline_mode = #tpu.pipeline_mode<synchronous>, transform_indices = @transform_3, window_bounds = array<i64: 64, 32>}, {pipeline_mode = #tpu.pipeline_mode<synchronous>, transform_indices = @transform_4, window_bounds = array<i64: 1, 32>}, {transform_indices = @transform_5, window_bounds = array<i64: 200, 32>}]} {
    %c0 = arith.constant 0 : index
    %c0_0 = arith.constant 0 : index
    %0 = vector.load %arg1[%c0, %c0_0] : memref<200x32xf32, #tpu.memory_space<vmem>>, vector<200x32xf32>
    %c0_1 = arith.constant 0 : index
    %c0_2 = arith.constant 0 : index
    %1 = vector.load %arg2[%c0_1, %c0_2] : memref<32x64xf32, #tpu.memory_space<vmem>>, vector<32x64xf32>
    %c0_3 = arith.constant 0 : index
    %c0_4 = arith.constant 0 : index
    %2 = vector.load %arg3[%c0_3, %c0_4] : memref<1x64xf32, #tpu.memory_space<vmem>>, vector<1x64xf32>
    %cst = arith.constant dense<0.000000e+00> : vector<200x64xf32>
    %3 = tpu.matmul %0, %1, %cst {dimension_numbers = #tpu.dot_dimension_numbers<[1], [0], [0], [1], [0, 0, 1, 1], [], []>} : vector<200x32xf32>, vector<32x64xf32>, vector<200x64xf32> -> vector<200x64xf32>
    %4 = vector.broadcast %2 : vector<1x64xf32> to vector<200x64xf32>
    %5 = arith.addf %3, %4 : vector<200x64xf32>
    %cst_5 = arith.constant 5.000000e-01 : f32
    %6 = vector.broadcast %cst_5 : f32 to vector<200x64xf32>
    %7 = arith.mulf %6, %5 : vector<200x64xf32>
    %cst_6 = arith.constant 0.707106769 : f32
    %8 = vector.broadcast %cst_6 : f32 to vector<200x64xf32>
    %9 = arith.mulf %5, %8 : vector<200x64xf32>
    %10 = math.erf %9 : vector<200x64xf32>
    %cst_7 = arith.constant 1.000000e+00 : f32
    %11 = vector.broadcast %cst_7 : f32 to vector<200x64xf32>
    %12 = arith.addf %11, %10 : vector<200x64xf32>
    %13 = arith.mulf %7, %12 : vector<200x64xf32>
    %c0_8 = arith.constant 0 : index
    %c0_9 = arith.constant 0 : index
    %14 = vector.load %arg4[%c0_8, %c0_9] : memref<64x32xf32, #tpu.memory_space<vmem>>, vector<64x32xf32>
    %c0_10 = arith.constant 0 : index
    %c0_11 = arith.constant 0 : index
    %15 = vector.load %arg5[%c0_10, %c0_11] : memref<1x32xf32, #tpu.memory_space<vmem>>, vector<1x32xf32>
    %cst_12 = arith.constant dense<0.000000e+00> : vector<200x32xf32>
    %16 = tpu.matmul %13, %14, %cst_12 {dimension_numbers = #tpu.dot_dimension_numbers<[1], [0], [0], [1], [0, 0, 1, 1], [], []>} : vector<200x64xf32>, vector<64x32xf32>, vector<200x32xf32> -> vector<200x32xf32>
    %17 = vector.broadcast %15 : vector<1x32xf32> to vector<200x32xf32>
    %18 = arith.addf %16, %17 : vector<200x32xf32>
    %cst_13 = arith.constant 5.000000e-01 : f32
    %19 = vector.broadcast %cst_13 : f32 to vector<200x32xf32>
    %20 = arith.mulf %19, %18 : vector<200x32xf32>
    %cst_14 = arith.constant 0.707106769 : f32
    %21 = vector.broadcast %cst_14 : f32 to vector<200x32xf32>
    %22 = arith.mulf %18, %21 : vector<200x32xf32>
    %23 = math.erf %22 : vector<200x32xf32>
    %cst_15 = arith.constant 1.000000e+00 : f32
    %24 = vector.broadcast %cst_15 : f32 to vector<200x32xf32>
    %25 = arith.addf %24, %23 : vector<200x32xf32>
    %26 = arith.mulf %20, %25 : vector<200x32xf32>
    %27 = arith.negf %26 : vector<200x32xf32>
    %28 = math.exp %27 : vector<200x32xf32>
    %cst_16 = arith.constant 1.000000e+00 : f32
    %29 = vector.broadcast %cst_16 : f32 to vector<200x32xf32>
    %30 = arith.addf %29, %28 : vector<200x32xf32>
    %31 = arith.divf %29, %30 : vector<200x32xf32>
    %c0_17 = arith.constant 0 : index
    %c0_18 = arith.constant 0 : index
    %32 = vector.load %arg6[%c0_17, %c0_18] : memref<200x32xf32, #tpu.memory_space<vmem>>, vector<200x32xf32>
    tpu.vector_store %arg6[%c0_17, %c0_18], %31 {strides = array<i32>} : memref<200x32xf32, #tpu.memory_space<vmem>>, vector<200x32xf32>,
    return
  }
  func.func @transform_0(%arg0: i32) -> (i32, i32) {
    %c0_i32 = arith.constant 0 : i32
    %c0_i32_0 = arith.constant 0 : i32
    return %arg0, %c0_i32 : i32, i32
  }
  func.func @transform_1(%arg0: i32) -> (i32, i32) {
    %c0_i32 = arith.constant 0 : i32
    %c0_i32_0 = arith.constant 0 : i32
    %c0_i32_1 = arith.constant 0 : i32
    return %c0_i32, %c0_i32_0 : i32, i32
  }
  func.func @transform_2(%arg0: i32) -> (i32, i32) {
    %c0_i32 = arith.constant 0 : i32
    %c0_i32_0 = arith.constant 0 : i32
    %c0_i32_1 = arith.constant 0 : i32
    return %c0_i32, %c0_i32_0 : i32, i32
  }
  func.func @transform_3(%arg0: i32) -> (i32, i32) {
    %c0_i32 = arith.constant 0 : i32
    %c0_i32_0 = arith.constant 0 : i32
    %c0_i32_1 = arith.constant 0 : i32
    return %c0_i32, %c0_i32_0 : i32, i32
  }
  func.func @transform_4(%arg0: i32) -> (i32, i32) {
    %c0_i32 = arith.constant 0 : i32
    %c0_i32_0 = arith.constant 0 : i32
    %c0_i32_1 = arith.constant 0 : i32
    return %c0_i32, %c0_i32_0 : i32, i32
  }
  func.func @transform_5(%arg0: i32) -> (i32, i32) {
    %c0_i32 = arith.constant 0 : i32
    %c0_i32_0 = arith.constant 0 : i32
    return %arg0, %c0_i32 : i32, i32
  }
}

</mosaic_0001>

<bundles_post_ra>
// kernel: tpu_custom_call.1
= control target key start
LH: loop header
LB: loop body
LE: loop exit
PB: predicated region body
PF: predicated region fallthrough
CT: control target
= control target key end

     0   :  { %v1574_v0 = vmov 0.0|0.0   ;;  %vm1575_vm0 = vmmov 0   ;;  %v1576_v4 = vmov 0.0   ;;  %vm56_vm1 = vcmask 261120   ;;  %s2038_s1 = inlined_call_operand.vmem [shape: f32[32,64], index: 1, kind: input, shape index: {}]   ;;  %s2039_s0 = inlined_call_operand.vmem [shape: f32[200,32], index: 0, kind: input, shape index: {}]   ;;  %s2040_s3 = inlined_call_operand.vmem [shape: f32[64,32], index: 3, kind: input, shape index: {}]   ;;  %s2041_s2 = inlined_call_operand.vmem [shape: f32[1,64], index: 2, kind: input, shape index: {}]   ;;  %s2042_s4 = inlined_call_operand.vmem [shape: f32[1,32], index: 4, kind: input, shape index: {}]   ;;  %s2043_s5 = inlined_call_operand.vmem [shape: f32[200,32], index: 5, kind: output, shape index: {}]  }
   0x1   :  { %1345 = vmatprep.subr.bf16.mxu0 %v1574_v0  ;;  %v45_v1 = vld [vmem:[%s2038_s1] sm:$0xff]  ;;  %v46_v2 = vld [vmem:[%s2038_s1 + $0x8] sm:$0xff]  ;;  %v47_v3 = vld [vmem:[%s2038_s1 + $0x10] sm:$0xff]  ;;  %1179 = vmatprep.mubr.msk.f32.mxu0 %vm1575_vm0, %v1576_v4  ;;  %vm462_vm2 = vcmask 523264  }
   0x2   :  { %v1346_v5 = vpack.c.bf16 %v46_v2, %v45_v1  ;;  %v48_v6 = vld [vmem:[%s2038_s1 + $0x18] sm:$0xff]  ;;  %1363 = vmatprep.subr.bf16.mxu1 %v1574_v0  ;;  %1273 = vmatprep.mubr.msk.f32.mxu1 %vm1575_vm0, %v1576_v4  ;;  %v20_v8 = vld [vmem:[%s2039_s0] sm:$0xff]  ;;  %v21_v9 = vld [vmem:[%s2039_s0 + $0x8] sm:$0xff] }
   0x3   :  { %v1349_v7 = vpack.c.bf16 %v48_v6, %v47_v3  ;;  %v22_v10 = vld [vmem:[%s2039_s0 + $0x10] sm:$0xff]  ;;  %v23_v11 = vld [vmem:[%s2039_s0 + $0x18] sm:$0xff]  ;;  %v24_v12 = vld [vmem:[%s2039_s0 + $0x20] sm:$0xff] }
   0x4   :  { %1347 = vmatpush3.bf16.msra.mxu0 %v1346_v5  ;;  %v25_v13 = vld [vmem:[%s2039_s0 + $0x28] sm:$0xff]  ;;  %v26_v14 = vld [vmem:[%s2039_s0 + $0x30] sm:$0xff]  ;;  %v27_v15 = vld [vmem:[%s2039_s0 + $0x38] sm:$0xff] }
   0x5   :  { %1348 = vmatprep.subr.bf16.mxu0 %v1574_v0  ;;  %v28_v16 = vld [vmem:[%s2039_s0 + $0x40] sm:$0xff]  ;;  %v29_v17 = vld [vmem:[%s2039_s0 + $0x48] sm:$0xff]  ;;  %v30_v18 = vld [vmem:[%s2039_s0 + $0x50] sm:$0xff] }
   0x6   :  { %v31_v19 = vld [vmem:[%s2039_s0 + $0x58] sm:$0xff]  ;;  %v32_v20 = vld [vmem:[%s2039_s0 + $0x60] sm:$0xff]  ;;  %v33_v21 = vld [vmem:[%s2039_s0 + $0x68] sm:$0xff] }
   0x7   :  { %v34_v22 = vld [vmem:[%s2039_s0 + $0x70] sm:$0xff]  ;;  %v35_v23 = vld [vmem:[%s2039_s0 + $0x78] sm:$0xff]  ;;  %v36_v24 = vld [vmem:[%s2039_s0 + $0x80] sm:$0xff] }
   0x8   :  { %1350 = vmatpush3.bf16.msra.mxu0 %v1349_v7  ;;  %v37_v25 = vld [vmem:[%s2039_s0 + $0x88] sm:$0xff]  ;;  %v38_v26 = vld [vmem:[%s2039_s0 + $0x90] sm:$0xff]  ;;  %v39_v27 = vld [vmem:[%s2039_s0 + $0x98] sm:$0xff] }
   0x9   :  { %1351 = vmatprep.subr.bf16.mxu0 %v1574_v0  ;;  %v40_v28 = vld [vmem:[%s2039_s0 + $0xa0] sm:$0xff]  ;;  %v41_v29 = vld [vmem:[%s2039_s0 + $0xa8] sm:$0xff]  ;;  %v42_v30 = vld [vmem:[%s2039_s0 + $0xb0] sm:$0xff] }
   0xa   :  { %v447_v31 = vld [vmem:[%s2040_s3] sm:$0xff]  ;;  %v448_v32 = vld [vmem:[%s2040_s3 + $0x8] sm:$0xff]  ;;  %v43_v34 = vld [vmem:[%s2039_s0 + $0xb8] sm:$0xff] }
   0xb   :  { %1180 = vmatmul.mubr.msk.f32.vlgmr.msra.gmra.mrb[0].mxu0 %vm56_vm1, %v20_v8  ;;  %v1352_v33 = vpack.c.bf16 %v448_v32, %v447_v31  ;;  %v449_v35 = vld [vmem:[%s2040_s3 + $0x10] sm:$0xff]  ;;  %v450_v36 = vld [vmem:[%s2040_s3 + $0x18] sm:$0xff]  ;;  %v44_v38 = vld [vmem:[%s2039_s0 + $0xc0] sm:$0xff] }
   0xc   :  { %1182 = vmatprep.mubr.msk.f32.mxu0 %vm1575_vm0, %v1576_v4  ;;  %v1355_v37 = vpack.c.bf16 %v450_v36, %v449_v35  ;;  %v451_v39 = vld [vmem:[%s2040_s3 + $0x20] sm:$0xff]  ;;  %v452_v40 = vld [vmem:[%s2040_s3 + $0x28] sm:$0xff]  ;;  %v453_v42 = vld [vmem:[%s2040_s3 + $0x30] sm:$0xff] }
   0xd   :  { %1367 = vmatpush3.bf16.msra.mxu1 %v1352_v33  ;;  %1353 = vmatpush3.bf16.msra.mxu0 %v1352_v33  ;;  %v1358_v41 = vpack.c.bf16 %v452_v40, %v451_v39  ;;  %v454_v43 = vld [vmem:[%s2040_s3 + $0x38] sm:$0xff]  ;;  %v1810_v45 = vld [vmem:[%s2041_s2] ss:$0 sm:$0xff] }
   0xe   :  { %1354 = vmatprep.subr.bf16.mxu0 %v1574_v0  ;;  %1364 = vmatprep.subr.bf16.mxu1 %v1574_v0  ;;  %v1361_v44 = vpack.c.bf16 %v454_v43, %v453_v42 }
   0xf   :  { %1183 = vmatmul.mubr.msk.f32.gmra.mrb[2].mxu0 %vm56_vm1, %v21_v9 }
  0x10   :  { %1185 = vmatprep.mubr.msk.f32.mxu0 %vm1575_vm0, %v1576_v4 }
  0x11   :  { %1368 = vmatpush3.bf16.msra.mxu1 %v1355_v37  ;;  %1356 = vmatpush3.bf16.msra.mxu0 %v1355_v37 }
  0x12   :  { %1357 = vmatprep.subr.bf16.mxu0 %v1574_v0  ;;  %1365 = vmatprep.subr.bf16.mxu1 %v1574_v0 }
  0x13   :  { %1186 = vmatmul.mubr.msk.f32.gmra.mrb[4].mxu0 %vm56_vm1, %v22_v10 }
  0x14   :  { %1188 = vmatprep.mubr.msk.f32.mxu0 %vm1575_vm0, %v1576_v4 }
  0x15   :  { %1369 = vmatpush3.bf16.msra.mxu1 %v1358_v41  ;;  %1359 = vmatpush3.bf16.msra.mxu0 %v1358_v41 }
  0x16   :  { %1360 = vmatprep.subr.bf16.mxu0 %v1574_v0  ;;  %1366 = vmatprep.subr.bf16.mxu1 %v1574_v0 }
  0x17   :  { %1189 = vmatmul.mubr.msk.f32.gmra.mrb[6].mxu0 %vm56_vm1, %v23_v11 }
  0x18   :  { %1191 = vmatprep.mubr.msk.f32.mxu0 %vm1575_vm0, %v1576_v4 }
  0x19   :  { %1370 = vmatpush3.bf16.msra.mxu1 %v1361_v44  ;;  %1362 = vmatpush3.bf16.msra.mxu0 %v1361_v44 }
  0x1b   :  { %1192 = vmatmul.mubr.msk.f32.gmra.mrb[8].mxu0 %vm56_vm1, %v24_v12 }
  0x1c   :  { %1194 = vmatprep.mubr.msk.f32.mxu0 %vm1575_vm0, %v1576_v4 }
  0x1f   :  { %1195 = vmatmul.mubr.msk.f32.gmra.mrb[10].mxu0 %vm56_vm1, %v25_v13 }
  0x20   :  { %1197 = vmatprep.mubr.msk.f32.mxu0 %vm1575_vm0, %v1576_v4 }
  0x23   :  { %1198 = vmatmul.mubr.msk.f32.gmra.mrb[12].mxu0 %vm56_vm1, %v26_v14 }
  0x24   :  { %1200 = vmatprep.mubr.msk.f32.mxu0 %vm1575_vm0, %v1576_v4 }
  0x27   :  { %1201 = vmatmul.mubr.msk.f32.gmra.mrb[14].mxu0 %vm56_vm1, %v27_v15 }
  0x28   :  { %1203 = vmatprep.mubr.msk.f32.mxu0 %vm1575_vm0, %v1576_v4 }
  0x2b   :  { %1204 = vmatmul.mubr.msk.f32.gmra.mrb[16].mxu0 %vm56_vm1, %v28_v16 }
  0x2c   :  { %1206 = vmatprep.mubr.msk.f32.mxu0 %vm1575_vm0, %v1576_v4 }
  0x2f   :  { %1207 = vmatmul.mubr.msk.f32.gmra.mrb[18].mxu0 %vm56_vm1, %v29_v17 }
  0x30   :  { %1209 = vmatprep.mubr.msk.f32.mxu0 %vm1575_vm0, %v1576_v4 }
  0x33   :  { %1210 = vmatmul.mubr.msk.f32.gmra.mrb[20].mxu0 %vm56_vm1, %v30_v18 }
  0x34   :  { %1212 = vmatprep.mubr.msk.f32.mxu0 %vm1575_vm0, %v1576_v4 }
  0x37   :  { %1213 = vmatmul.mubr.msk.f32.gmra.mrb[22].mxu0 %vm56_vm1, %v31_v19 }
  0x38   :  { %1215 = vmatprep.mubr.msk.f32.mxu0 %vm1575_vm0, %v1576_v4 }
  0x3b   :  { %1216 = vmatmul.mubr.msk.f32.gmra.mrb[24].mxu0 %vm56_vm1, %v32_v20 }
  0x3c   :  { %1218 = vmatprep.mubr.msk.f32.mxu0 %vm1575_vm0, %v1576_v4 }
  0x3f   :  { %1219 = vmatmul.mubr.msk.f32.gmra.mrb[26].mxu0 %vm56_vm1, %v33_v21 }
  0x40   :  { %1221 = vmatprep.mubr.msk.f32.mxu0 %vm1575_vm0, %v1576_v4 }
  0x43   :  { %1222 = vmatmul.mubr.msk.f32.gmra.mrb[28].mxu0 %vm56_vm1, %v34_v22 }
  0x44   :  { %1224 = vmatprep.mubr.msk.f32.mxu0 %vm1575_vm0, %v1576_v4 }
  0x47   :  { %1225 = vmatmul.mubr.msk.f32.gmra.mrb[30].mxu0 %vm56_vm1, %v35_v23 }
  0x48   :  { %1227 = vmatprep.mubr.msk.f32.mxu0 %vm1575_vm0, %v1576_v4 }
  0x4b   :  { %1228 = vmatmul.mubr.msk.f32.gmra.mrb[32].mxu0 %vm56_vm1, %v36_v24 }
  0x4c   :  { %1230 = vmatprep.mubr.msk.f32.mxu0 %vm1575_vm0, %v1576_v4 }
  0x4f   :  { %1231 = vmatmul.mubr.msk.f32.gmra.mrb[34].mxu0 %vm56_vm1, %v37_v25 }
  0x50   :  { %1233 = vmatprep.mubr.msk.f32.mxu0 %vm1575_vm0, %v1576_v4 }
  0x53   :  { %1234 = vmatmul.mubr.msk.f32.gmra.mrb[36].mxu0 %vm56_vm1, %v38_v26 }
  0x54   :  { %1236 = vmatprep.mubr.msk.f32.mxu0 %vm1575_vm0, %v1576_v4 }
  0x57   :  { %1237 = vmatmul.mubr.msk.f32.gmra.mrb[38].mxu0 %vm56_vm1, %v39_v27 }
  0x58   :  { %1239 = vmatprep.mubr.msk.f32.mxu0 %vm1575_vm0, %v1576_v4 }
  0x5b   :  { %1240 = vmatmul.mubr.msk.f32.gmra.mrb[40].mxu0 %vm56_vm1, %v40_v28 }
  0x5c   :  { %1242 = vmatprep.mubr.msk.f32.mxu0 %vm1575_vm0, %v1576_v4 }
  0x5f   :  { %1243 = vmatmul.mubr.msk.f32.gmra.mrb[42].mxu0 %vm56_vm1, %v41_v29 }
  0x60   :  { %1245 = vmatprep.mubr.msk.f32.mxu0 %vm1575_vm0, %v1576_v4 }
  0x63   :  { %1246 = vmatmul.mubr.msk.f32.gmra.mrb[44].mxu0 %vm56_vm1, %v42_v30 }
  0x64   :  { %1248 = vmatprep.mubr.msk.f32.mxu0 %vm1575_vm0, %v1576_v4 }
  0x67   :  { %1249 = vmatmul.mubr.msk.f32.gmra.mrb[46].mxu0 %vm56_vm1, %v43_v34 }
  0x68   :  { %1251 = vmatprep.mubr.msk.f32.mxu0 %vm1575_vm0, %v1576_v4 }
  0x6b   :  { %1252 = vmatmul.mubr.msk.f32.gmra.mrb[48].mxu0 %vm56_vm1, %v44_v38 }
  0x6c   :  { %1270 = vmatprep.mubr.msk.f32.mxu0 %vm1575_vm0, %v1576_v4 }
  0xde   :  { %v198_v46 = vpop.f32.mrb[0].mxu0 }
  0xdf   :  { %v199_v47 = vadd.f32 %v1810_v45, %v198_v46  ;;  %v1181_v48 = vpop.f32.mrb[1].mxu0 }
  0xe1   :  { %v347_v49 = vmul.f32 0.70710677, %v199_v47  ;;  %v322_v63 = vmul.f32 0.5, %v199_v47 }
  0xe2   :  { %v203_v50 = vpop.f32.mrb[2].mxu0 }
  0xe3   :  { %1374 = verf.f32 %v347_v49  ;;  %v204_v51 = vadd.f32 %v1810_v45, %v203_v50  ;;  %v1184_v52 = vpop.f32.mrb[3].mxu0 }
  0xe5   :  { %v348_v53 = vmul.f32 0.70710677, %v204_v51  ;;  %v323_v8 = vmul.f32 0.5, %v204_v51 }
  0xe6   :  { %v208_v54 = vpop.f32.mrb[4].mxu0 }
  0xe7   :  { %1376 = verf.f32 %v348_v53  ;;  %v209_v55 = vadd.f32 %v1810_v45, %v208_v54  ;;  %v1187_v56 = vpop.f32.mrb[5].mxu0 }
  0xe9   :  { %v349_v57 = vmul.f32 0.70710677, %v209_v55  ;;  %v324_v16 = vmul.f32 0.5, %v209_v55 }
  0xea   :  { %v213_v58 = vpop.f32.mrb[6].mxu0 }
  0xeb   :  { %1378 = verf.f32 %v349_v57  ;;  %v214_v59 = vadd.f32 %v1810_v45, %v213_v58  ;;  %v1190_v60 = vpop.f32.mrb[7].mxu0 }
  0xed   :  { %v1375_v61 = vpop.eup %1374  ;;  %v350_v62 = vmul.f32 0.70710677, %v214_v59  ;;  %v325_v24 = vmul.f32 0.5, %v214_v59 }
  0xee   :  { %v397_v0 = vadd.f32 1.0, %v1375_v61  ;;  %v218_v1 = vpop.f32.mrb[8].mxu0 }
  0xef   :  { %1380 = verf.f32 %v350_v62  ;;  %v219_v2 = vadd.f32 %v1810_v45, %v218_v1  ;;  %v1193_v3 = vpop.f32.mrb[9].mxu0 }
  0xf0   :  { %v422_v5 = vmul.f32 %v397_v0, %v322_v63 }
  0xf1   :  { %v1377_v6 = vpop.eup %1376  ;;  %v351_v7 = vmul.f32 0.70710677, %v219_v2  ;;  %v326_v32 = vmul.f32 0.5, %v219_v2 }
  0xf2   :  { %v398_v9 = vadd.f32 1.0, %v1377_v6  ;;  %v223_v10 = vpop.f32.mrb[10].mxu0  ;;  %1271 = vmatmul.mubr.msk.f32.vlgmr.msra.gmra.mrb[50].mxu0 %vm462_vm2, %v422_v5 }
  0xf3   :  { %1382 = verf.f32 %v351_v7  ;;  %v224_v11 = vadd.f32 %v1810_v45, %v223_v10  ;;  %v1196_v12 = vpop.f32.mrb[11].mxu0 }
  0xf4   :  { %v423_v13 = vmul.f32 %v398_v9, %v323_v8 }
  0xf5   :  { %v1379_v14 = vpop.eup %1378  ;;  %v352_v15 = vmul.f32 0.70710677, %v224_v11  ;;  %v327_v40 = vmul.f32 0.5, %v224_v11 }
  0xf6   :  { %v399_v17 = vadd.f32 1.0, %v1379_v14  ;;  %v228_v18 = vpop.f32.mrb[12].mxu0  ;;  %1274 = vmatmul.mubr.msk.f32.vlgmr.msra.gmra.mrb[0].mxu1 %vm462_vm2, %v423_v13 }
  0xf7   :  { %1384 = verf.f32 %v352_v15  ;;  %v229_v19 = vadd.f32 %v1810_v45, %v228_v18  ;;  %v1199_v20 = vpop.f32.mrb[13].mxu0  ;;  %1276 = vmatprep.mubr.msk.f32.mxu1 %vm1575_vm0, %v1576_v4 }
  0xf8   :  { %v424_v21 = vmul.f32 %v399_v17, %v324_v16 }
  0xf9   :  { %v1381_v22 = vpop.eup %1380  ;;  %v353_v23 = vmul.f32 0.70710677, %v229_v19  ;;  %v328_v49 = vmul.f32 0.5, %v229_v19 }
  0xfa   :  { %v400_v25 = vadd.f32 1.0, %v1381_v22  ;;  %v233_v26 = vpop.f32.mrb[14].mxu0  ;;  %1277 = vmatmul.mubr.msk.f32.gmra.mrb[2].mxu1 %vm462_vm2, %v424_v21 }
  0xfb   :  { %1386 = verf.f32 %v353_v23  ;;  %v234_v27 = vadd.f32 %v1810_v45, %v233_v26  ;;  %v1202_v28 = vpop.f32.mrb[15].mxu0  ;;  %1279 = vmatprep.mubr.msk.f32.mxu1 %vm1575_vm0, %v1576_v4 }
  0xfc   :  { %v425_v29 = vmul.f32 %v400_v25, %v325_v24 }
  0xfd   :  { %v1383_v30 = vpop.eup %1382  ;;  %v354_v31 = vmul.f32 0.70710677, %v234_v27  ;;  %v329_v57 = vmul.f32 0.5, %v234_v27 }
  0xfe   :  { %v401_v33 = vadd.f32 1.0, %v1383_v30  ;;  %v238_v34 = vpop.f32.mrb[16].mxu0  ;;  %1280 = vmatmul.mubr.msk.f32.gmra.mrb[4].mxu1 %vm462_vm2, %v425_v29 }
  0xff   :  { %1388 = verf.f32 %v354_v31  ;;  %v239_v35 = vadd.f32 %v1810_v45, %v238_v34  ;;  %v1205_v36 = vpop.f32.mrb[17].mxu0  ;;  %1282 = vmatprep.mubr.msk.f32.mxu1 %vm1575_vm0, %v1576_v4 }
 0x100   :  { %v426_v37 = vmul.f32 %v401_v33, %v326_v32 }
 0x101   :  { %v1385_v38 = vpop.eup %1384  ;;  %v355_v39 = vmul.f32 0.70710677, %v239_v35  ;;  %v330_v1 = vmul.f32 0.5, %v239_v35 }
 0x102   :  { %v402_v41 = vadd.f32 1.0, %v1385_v38  ;;  %v243_v42 = vpop.f32.mrb[18].mxu0  ;;  %1283 = vmatmul.mubr.msk.f32.gmra.mrb[6].mxu1 %vm462_vm2, %v426_v37 }
 0x103   :  { %1390 = verf.f32 %v355_v39  ;;  %v244_v43 = vadd.f32 %v1810_v45, %v243_v42  ;;  %v1208_v44 = vpop.f32.mrb[19].mxu0  ;;  %1285 = vmatprep.mubr.msk.f32.mxu1 %vm1575_vm0, %v1576_v4 }
 0x104   :  { %v427_v46 = vmul.f32 %v402_v41, %v327_v40 }
 0x105   :  { %v1387_v47 = vpop.eup %1386  ;;  %v356_v48 = vmul.f32 0.70710677, %v244_v43  ;;  %v331_v10 = vmul.f32 0.5, %v244_v43 }
 0x106   :  { %v403_v50 = vadd.f32 1.0, %v1387_v47  ;;  %v248_v51 = vpop.f32.mrb[20].mxu0  ;;  %1286 = vmatmul.mubr.msk.f32.gmra.mrb[8].mxu1 %vm462_vm2, %v427_v46 }
 0x107   :  { %1392 = verf.f32 %v356_v48  ;;  %v249_v52 = vadd.f32 %v1810_v45, %v248_v51  ;;  %v1211_v53 = vpop.f32.mrb[21].mxu0  ;;  %1288 = vmatprep.mubr.msk.f32.mxu1 %vm1575_vm0, %v1576_v4 }
 0x108   :  { %v428_v54 = vmul.f32 %v403_v50, %v328_v49 }
 0x109   :  { %v1389_v55 = vpop.eup %1388  ;;  %v357_v56 = vmul.f32 0.70710677, %v249_v52  ;;  %v332_v18 = vmul.f32 0.5, %v249_v52 }
 0x10a   :  { %v404_v58 = vadd.f32 1.0, %v1389_v55  ;;  %v253_v59 = vpop.f32.mrb[22].mxu0  ;;  %1289 = vmatmul.mubr.msk.f32.gmra.mrb[10].mxu1 %vm462_vm2, %v428_v54 }
 0x10b   :  { %1394 = verf.f32 %v357_v56  ;;  %v254_v60 = vadd.f32 %v1810_v45, %v253_v59  ;;  %v1214_v61 = vpop.f32.mrb[23].mxu0  ;;  %1291 = vmatprep.mubr.msk.f32.mxu1 %vm1575_vm0, %v1576_v4 }
 0x10c   :  { %v429_v62 = vmul.f32 %v404_v58, %v329_v57 }
 0x10d   :  { %v1391_v63 = vpop.eup %1390  ;;  %v358_v0 = vmul.f32 0.70710677, %v254_v60  ;;  %v333_v26 = vmul.f32 0.5, %v254_v60 }
 0x10e   :  { %v405_v2 = vadd.f32 1.0, %v1391_v63  ;;  %v258_v3 = vpop.f32.mrb[24].mxu0  ;;  %1292 = vmatmul.mubr.msk.f32.gmra.mrb[12].mxu1 %vm462_vm2, %v429_v62 }
 0x10f   :  { %1396 = verf.f32 %v358_v0  ;;  %v259_v5 = vadd.f32 %v1810_v45, %v258_v3  ;;  %v1217_v6 = vpop.f32.mrb[25].mxu0  ;;  %1294 = vmatprep.mubr.msk.f32.mxu1 %vm1575_vm0, %v1576_v4 }
 0x110   :  { %v430_v7 = vmul.f32 %v405_v2, %v330_v1 }
 0x111   :  { %v1393_v8 = vpop.eup %1392  ;;  %v359_v9 = vmul.f32 0.70710677, %v259_v5  ;;  %v334_v34 = vmul.f32 0.5, %v259_v5 }
 0x112   :  { %v406_v11 = vadd.f32 1.0, %v1393_v8  ;;  %v263_v12 = vpop.f32.mrb[26].mxu0  ;;  %1295 = vmatmul.mubr.msk.f32.gmra.mrb[14].mxu1 %vm462_vm2, %v430_v7 }
 0x113   :  { %1398 = verf.f32 %v359_v9  ;;  %v264_v13 = vadd.f32 %v1810_v45, %v263_v12  ;;  %v1220_v14 = vpop.f32.mrb[27].mxu0  ;;  %1297 = vmatprep.mubr.msk.f32.mxu1 %vm1575_vm0, %v1576_v4 }
 0x114   :  { %v431_v15 = vmul.f32 %v406_v11, %v331_v10 }
 0x115   :  { %v1395_v16 = vpop.eup %1394  ;;  %v360_v17 = vmul.f32 0.70710677, %v264_v13  ;;  %v335_v42 = vmul.f32 0.5, %v264_v13 }
 0x116   :  { %v407_v19 = vadd.f32 1.0, %v1395_v16  ;;  %v268_v20 = vpop.f32.mrb[28].mxu0  ;;  %1298 = vmatmul.mubr.msk.f32.gmra.mrb[16].mxu1 %vm462_vm2, %v431_v15 }
 0x117   :  { %1400 = verf.f32 %v360_v17  ;;  %v269_v21 = vadd.f32 %v1810_v45, %v268_v20  ;;  %v1223_v22 = vpop.f32.mrb[29].mxu0  ;;  %1300 = vmatprep.mubr.msk.f32.mxu1 %vm1575_vm0, %v1576_v4 }
 0x118   :  { %v432_v23 = vmul.f32 %v407_v19, %v332_v18 }
 0x119   :  { %v1397_v24 = vpop.eup %1396  ;;  %v361_v25 = vmul.f32 0.70710677, %v269_v21  ;;  %v336_v51 = vmul.f32 0.5, %v269_v21 }
 0x11a   :  { %v408_v27 = vadd.f32 1.0, %v1397_v24  ;;  %v273_v28 = vpop.f32.mrb[30].mxu0  ;;  %1301 = vmatmul.mubr.msk.f32.gmra.mrb[18].mxu1 %vm462_vm2, %v432_v23 }
 0x11b   :  { %1402 = verf.f32 %v361_v25  ;;  %v274_v29 = vadd.f32 %v1810_v45, %v273_v28  ;;  %v1226_v30 = vpop.f32.mrb[31].mxu0  ;;  %1303 = vmatprep.mubr.msk.f32.mxu1 %vm1575_vm0, %v1576_v4 }
 0x11c   :  { %v433_v31 = vmul.f32 %v408_v27, %v333_v26 }
 0x11d   :  { %v1399_v32 = vpop.eup %1398  ;;  %v362_v33 = vmul.f32 0.70710677, %v274_v29  ;;  %v337_v59 = vmul.f32 0.5, %v274_v29 }
 0x11e   :  { %v409_v35 = vadd.f32 1.0, %v1399_v32  ;;  %v278_v36 = vpop.f32.mrb[32].mxu0  ;;  %1304 = vmatmul.mubr.msk.f32.gmra.mrb[20].mxu1 %vm462_vm2, %v433_v31 }
 0x11f   :  { %1404 = verf.f32 %v362_v33  ;;  %v279_v37 = vadd.f32 %v1810_v45, %v278_v36  ;;  %v1229_v38 = vpop.f32.mrb[33].mxu0  ;;  %1306 = vmatprep.mubr.msk.f32.mxu1 %vm1575_vm0, %v1576_v4 }
 0x120   :  { %v434_v39 = vmul.f32 %v409_v35, %v334_v34 }
 0x121   :  { %v1401_v40 = vpop.eup %1400  ;;  %v363_v41 = vmul.f32 0.70710677, %v279_v37  ;;  %v338_v3 = vmul.f32 0.5, %v279_v37 }
 0x122   :  { %v410_v43 = vadd.f32 1.0, %v1401_v40  ;;  %v283_v44 = vpop.f32.mrb[34].mxu0  ;;  %1307 = vmatmul.mubr.msk.f32.gmra.mrb[22].mxu1 %vm462_vm2, %v434_v39 }
 0x123   :  { %1406 = verf.f32 %v363_v41  ;;  %v284_v46 = vadd.f32 %v1810_v45, %v283_v44  ;;  %v1232_v47 = vpop.f32.mrb[35].mxu0  ;;  %1309 = vmatprep.mubr.msk.f32.mxu1 %vm1575_vm0, %v1576_v4 }
 0x124   :  { %v435_v48 = vmul.f32 %v410_v43, %v335_v42 }
 0x125   :  { %v1403_v49 = vpop.eup %1402  ;;  %v364_v50 = vmul.f32 0.70710677, %v284_v46  ;;  %v339_v12 = vmul.f32 0.5, %v284_v46 }
 0x126   :  { %v411_v52 = vadd.f32 1.0, %v1403_v49  ;;  %v288_v53 = vpop.f32.mrb[36].mxu0  ;;  %1310 = vmatmul.mubr.msk.f32.gmra.mrb[24].mxu1 %vm462_vm2, %v435_v48 }
 0x127   :  { %1408 = verf.f32 %v364_v50  ;;  %v289_v54 = vadd.f32 %v1810_v45, %v288_v53  ;;  %v1235_v55 = vpop.f32.mrb[37].mxu0  ;;  %1312 = vmatprep.mubr.msk.f32.mxu1 %vm1575_vm0, %v1576_v4 }
 0x128   :  { %v436_v56 = vmul.f32 %v411_v52, %v336_v51 }
 0x129   :  { %v1405_v57 = vpop.eup %1404  ;;  %v365_v58 = vmul.f32 0.70710677, %v289_v54  ;;  %v340_v20 = vmul.f32 0.5, %v289_v54 }
 0x12a   :  { %v412_v60 = vadd.f32 1.0, %v1405_v57  ;;  %v293_v61 = vpop.f32.mrb[38].mxu0  ;;  %1313 = vmatmul.mubr.msk.f32.gmra.mrb[26].mxu1 %vm462_vm2, %v436_v56 }
 0x12b   :  { %1410 = verf.f32 %v365_v58  ;;  %v294_v62 = vadd.f32 %v1810_v45, %v293_v61  ;;  %v1238_v63 = vpop.f32.mrb[39].mxu0  ;;  %1315 = vmatprep.mubr.msk.f32.mxu1 %vm1575_vm0, %v1576_v4 }
 0x12c   :  { %v437_v0 = vmul.f32 %v412_v60, %v337_v59  ;;  %v1911_v59 = vld [vmem:[%s2042_s4] ss:$0 sm:$0xff] }
 0x12d   :  { %v1407_v1 = vpop.eup %1406  ;;  %v366_v2 = vmul.f32 0.70710677, %v294_v62  ;;  %v341_v28 = vmul.f32 0.5, %v294_v62 }
 0x12e   :  { %v413_v5 = vadd.f32 1.0, %v1407_v1  ;;  %v298_v6 = vpop.f32.mrb[40].mxu0  ;;  %1316 = vmatmul.mubr.msk.f32.gmra.mrb[28].mxu1 %vm462_vm2, %v437_v0 }
 0x12f   :  { %1412 = verf.f32 %v366_v2  ;;  %v299_v7 = vadd.f32 %v1810_v45, %v298_v6  ;;  %v1241_v8 = vpop.f32.mrb[41].mxu0  ;;  %1318 = vmatprep.mubr.msk.f32.mxu1 %vm1575_vm0, %v1576_v4 }
 0x130   :  { %v438_v9 = vmul.f32 %v413_v5, %v338_v3 }
 0x131   :  { %v1409_v10 = vpop.eup %1408  ;;  %v367_v11 = vmul.f32 0.70710677, %v299_v7  ;;  %v342_v36 = vmul.f32 0.5, %v299_v7 }
 0x132   :  { %v414_v13 = vadd.f32 1.0, %v1409_v10  ;;  %v303_v14 = vpop.f32.mrb[42].mxu0  ;;  %1319 = vmatmul.mubr.msk.f32.gmra.mrb[30].mxu1 %vm462_vm2, %v438_v9 }
 0x133   :  { %1414 = verf.f32 %v367_v11  ;;  %v304_v15 = vadd.f32 %v1810_v45, %v303_v14  ;;  %v1244_v16 = vpop.f32.mrb[43].mxu0  ;;  %1321 = vmatprep.mubr.msk.f32.mxu1 %vm1575_vm0, %v1576_v4 }
 0x134   :  { %v439_v17 = vmul.f32 %v414_v13, %v339_v12 }
 0x135   :  { %v1411_v18 = vpop.eup %1410  ;;  %v368_v19 = vmul.f32 0.70710677, %v304_v15  ;;  %v343_v44 = vmul.f32 0.5, %v304_v15 }
 0x136   :  { %v415_v21 = vadd.f32 1.0, %v1411_v18  ;;  %v308_v22 = vpop.f32.mrb[44].mxu0  ;;  %1322 = vmatmul.mubr.msk.f32.gmra.mrb[32].mxu1 %vm462_vm2, %v439_v17 }
 0x137   :  { %1416 = verf.f32 %v368_v19  ;;  %v309_v23 = vadd.f32 %v1810_v45, %v308_v22  ;;  %v1247_v24 = vpop.f32.mrb[45].mxu0  ;;  %1324 = vmatprep.mubr.msk.f32.mxu1 %vm1575_vm0, %v1576_v4 }
 0x138   :  { %v440_v25 = vmul.f32 %v415_v21, %v340_v20 }
 0x139   :  { %v1413_v26 = vpop.eup %1412  ;;  %v369_v27 = vmul.f32 0.70710677, %v309_v23  ;;  %v344_v49 = vmul.f32 0.5, %v309_v23 }
 0x13a   :  { %v416_v29 = vadd.f32 1.0, %v1413_v26  ;;  %v313_v30 = vpop.f32.mrb[46].mxu0  ;;  %1325 = vmatmul.mubr.msk.f32.gmra.mrb[34].mxu1 %vm462_vm2, %v440_v25 }
 0x13b   :  { %1418 = verf.f32 %v369_v27  ;;  %v314_v31 = vadd.f32 %v1810_v45, %v313_v30  ;;  %v1250_v32 = vpop.f32.mrb[47].mxu0  ;;  %1327 = vmatprep.mubr.msk.f32.mxu1 %vm1575_vm0, %v1576_v4 }
 0x13c   :  { %v441_v33 = vmul.f32 %v416_v29, %v341_v28 }
 0x13d   :  { %v1415_v34 = vpop.eup %1414  ;;  %v370_v35 = vmul.f32 0.70710677, %v314_v31  ;;  %v345_v52 = vmul.f32 0.5, %v314_v31 }
 0x13e   :  { %v417_v37 = vadd.f32 1.0, %v1415_v34  ;;  %v318_v38 = vpop.f32.mrb[48].mxu0  ;;  %1328 = vmatmul.mubr.msk.f32.gmra.mrb[36].mxu1 %vm462_vm2, %v441_v33 }
 0x13f   :  { %1420 = verf.f32 %v370_v35  ;;  %v319_v39 = vadd.f32 %v1810_v45, %v318_v38  ;;  %v1253_v40 = vpop.f32.mrb[49].mxu0  ;;  %1330 = vmatprep.mubr.msk.f32.mxu1 %vm1575_vm0, %v1576_v4 }
 0x140   :  { %v442_v41 = vmul.f32 %v417_v37, %v342_v36 }
 0x141   :  { %v1417_v42 = vpop.eup %1416  ;;  %v371_v43 = vmul.f32 0.70710677, %v319_v39  ;;  %v346_v56 = vmul.f32 0.5, %v319_v39 }
 0x142   :  { %v418_v46 = vadd.f32 1.0, %v1417_v42  ;;  %1331 = vmatmul.mubr.msk.f32.gmra.mrb[38].mxu1 %vm462_vm2, %v442_v41 }
 0x143   :  { %1422 = verf.f32 %v371_v43  ;;  %1333 = vmatprep.mubr.msk.f32.mxu1 %vm1575_vm0, %v1576_v4 }
 0x144   :  { %v443_v47 = vmul.f32 %v418_v46, %v343_v44 }
 0x145   :  { %v1419_v48 = vpop.eup %1418 }
 0x146   :  { %v419_v50 = vadd.f32 1.0, %v1419_v48  ;;  %1334 = vmatmul.mubr.msk.f32.gmra.mrb[40].mxu1 %vm462_vm2, %v443_v47 }
 0x147   :  { %1336 = vmatprep.mubr.msk.f32.mxu1 %vm1575_vm0, %v1576_v4 }
 0x148   :  { %v444_v45 = vmul.f32 %v419_v50, %v344_v49 }
 0x149   :  { %v1421_v51 = vpop.eup %1420 }
 0x14a   :  { %v420_v53 = vadd.f32 1.0, %v1421_v51  ;;  %1337 = vmatmul.mubr.msk.f32.gmra.mrb[42].mxu1 %vm462_vm2, %v444_v45 }
 0x14b   :  { %1339 = vmatprep.mubr.msk.f32.mxu1 %vm1575_vm0, %v1576_v4 }
 0x14c   :  { %v445_v54 = vmul.f32 %v420_v53, %v345_v52 }
 0x14d   :  { %v1423_v55 = vpop.eup %1422 }
 0x14e   :  { %v421_v57 = vadd.f32 1.0, %v1423_v55  ;;  %1340 = vmatmul.mubr.msk.f32.gmra.mrb[44].mxu1 %vm462_vm2, %v445_v54 }
 0x14f   :  { %1342 = vmatprep.mubr.msk.f32.mxu1 %vm1575_vm0, %v1576_v4 }
 0x150   :  { %v446_v58 = vmul.f32 %v421_v57, %v346_v56 }
 0x152   :  { %1343 = vmatmul.mubr.msk.f32.gmra.mrb[46].mxu1 %vm462_vm2, %v446_v58 }
 0x1c5   :  { %v604_v60 = vpop.f32.mrb[50].mxu0 }
 0x1c6   :  { %v605_v61 = vadd.f32 %v1911_v59, %v604_v60  ;;  %v1272_v62 = vpop.f32.mrb[51].mxu0 }
 0x1c8   :  { %v753_v63 = vmul.f32 0.70710677, %v605_v61  ;;  %v728_v13 = vmul.f32 0.5, %v605_v61 }
 0x1c9   :  { %v609_v0 = vpop.f32.mrb[0].mxu1 }
 0x1ca   :  { %1424 = verf.f32 %v753_v63  ;;  %v610_v1 = vadd.f32 %v1911_v59, %v609_v0  ;;  %v1275_v2 = vpop.f32.mrb[1].mxu1 }
 0x1cc   :  { %v754_v3 = vmul.f32 0.70710677, %v610_v1  ;;  %v729_v22 = vmul.f32 0.5, %v610_v1 }
 0x1cd   :  { %v614_v4 = vpop.f32.mrb[2].mxu1 }
 0x1ce   :  { %1426 = verf.f32 %v754_v3  ;;  %v615_v5 = vadd.f32 %v1911_v59, %v614_v4  ;;  %v1278_v6 = vpop.f32.mrb[3].mxu1 }
 0x1d0   :  { %v755_v7 = vmul.f32 0.70710677, %v615_v5  ;;  %v730_v31 = vmul.f32 0.5, %v615_v5 }
 0x1d1   :  { %v619_v8 = vpop.f32.mrb[4].mxu1 }
 0x1d2   :  { %1428 = verf.f32 %v755_v7  ;;  %v620_v9 = vadd.f32 %v1911_v59, %v619_v8  ;;  %v1281_v10 = vpop.f32.mrb[5].mxu1 }
 0x1d4   :  { %v1425_v11 = vpop.eup %1424  ;;  %v756_v12 = vmul.f32 0.70710677, %v620_v9  ;;  %v731_v40 = vmul.f32 0.5, %v620_v9 }
 0x1d5   :  { %v803_v14 = vadd.f32 1.0, %v1425_v11  ;;  %v624_v15 = vpop.f32.mrb[6].mxu1 }
 0x1d6   :  { %1430 = verf.f32 %v756_v12  ;;  %v625_v16 = vadd.f32 %v1911_v59, %v624_v15  ;;  %v1284_v17 = vpop.f32.mrb[7].mxu1 }
 0x1d7   :  { %v828_v18 = vmul.f32 %v803_v14, %v728_v13 }
 0x1d8   :  { %v1427_v19 = vpop.eup %1426  ;;  %v757_v20 = vmul.f32 0.70710677, %v625_v16  ;;  %v732_v45 = vmul.f32 0.5, %v625_v16 }
 0x1d9   :  { %v1084_v21 = vmul.f32 -1.442695, %v828_v18  ;;  %v804_v23 = vadd.f32 1.0, %v1427_v19  ;;  %v629_v24 = vpop.f32.mrb[8].mxu1 }
 0x1da   :  { %1432 = verf.f32 %v757_v20  ;;  %v630_v25 = vadd.f32 %v1911_v59, %v629_v24  ;;  %v1287_v26 = vpop.f32.mrb[9].mxu1 }
 0x1db   :  { %1434 = vpow2.f32 %v1084_v21  ;;  %v829_v27 = vmul.f32 %v804_v23, %v729_v22 }
 0x1dc   :  { %v1429_v28 = vpop.eup %1428  ;;  %v758_v29 = vmul.f32 0.70710677, %v630_v25  ;;  %v733_v62 = vmul.f32 0.5, %v630_v25 }
 0x1dd   :  { %v1085_v30 = vmul.f32 -1.442695, %v829_v27  ;;  %v805_v32 = vadd.f32 1.0, %v1429_v28  ;;  %v634_v33 = vpop.f32.mrb[10].mxu1 }
 0x1de   :  { %1436 = verf.f32 %v758_v29  ;;  %v635_v34 = vadd.f32 %v1911_v59, %v634_v33  ;;  %v1290_v35 = vpop.f32.mrb[11].mxu1 }
 0x1df   :  { %1438 = vpow2.f32 %v1085_v30  ;;  %v830_v36 = vmul.f32 %v805_v32, %v730_v31 }
 0x1e0   :  { %v1431_v37 = vpop.eup %1430  ;;  %v759_v38 = vmul.f32 0.70710677, %v635_v34  ;;  %v734_v9 = vmul.f32 0.5, %v635_v34 }
 0x1e1   :  { %v1086_v39 = vmul.f32 -1.442695, %v830_v36  ;;  %v806_v41 = vadd.f32 1.0, %v1431_v37  ;;  %v639_v42 = vpop.f32.mrb[12].mxu1 }
 0x1e2   :  { %1440 = verf.f32 %v759_v38  ;;  %v640_v43 = vadd.f32 %v1911_v59, %v639_v42  ;;  %v1293_v44 = vpop.f32.mrb[13].mxu1 }
 0x1e3   :  { %1442 = vpow2.f32 %v1086_v39  ;;  %v831_v46 = vmul.f32 %v806_v41, %v731_v40 }
 0x1e4   :  { %v1433_v47 = vpop.eup %1432  ;;  %v760_v48 = vmul.f32 0.70710677, %v640_v43  ;;  %v735_v20 = vmul.f32 0.5, %v640_v43 }
 0x1e5   :  { %v1435_v49 = vpop.eup %1434  ;;  %v1087_v50 = vmul.f32 -1.442695, %v831_v46  ;;  %v807_v51 = vadd.f32 1.0, %v1433_v47  ;;  %v644_v52 = vpop.f32.mrb[14].mxu1 }
 0x1e6   :  { %v928_v53 = vadd.f32 1.0, %v1435_v49  ;;  %1444 = verf.f32 %v760_v48  ;;  %v645_v54 = vadd.f32 %v1911_v59, %v644_v52  ;;  %v1296_v55 = vpop.f32.mrb[15].mxu1 }
 0x1e7   :  { %1446 = vpow2.f32 %v1087_v50  ;;  %v832_v56 = vmul.f32 %v807_v51, %v732_v45 }
 0x1e8   :  { %v1437_v57 = vpop.eup %1436  ;;  %1448 = vrcp.f32 %v928_v53  ;;  %v761_v58 = vmul.f32 0.70710677, %v645_v54  ;;  %v736_v32 = vmul.f32 0.5, %v645_v54 }
 0x1e9   :  { %v1439_v60 = vpop.eup %1438  ;;  %v1088_v61 = vmul.f32 -1.442695, %v832_v56  ;;  %v808_v63 = vadd.f32 1.0, %v1437_v57  ;;  %v649_v0 = vpop.f32.mrb[16].mxu1 }
 0x1ea   :  { %v929_v1 = vadd.f32 1.0, %v1439_v60  ;;  %1450 = verf.f32 %v761_v58  ;;  %v650_v2 = vadd.f32 %v1911_v59, %v649_v0  ;;  %v1299_v3 = vpop.f32.mrb[17].mxu1 }
 0x1eb   :  { %1452 = vpow2.f32 %v1088_v61  ;;  %v833_v4 = vmul.f32 %v808_v63, %v733_v62 }
 0x1ec   :  { %v1441_v5 = vpop.eup %1440  ;;  %1454 = vrcp.f32 %v929_v1  ;;  %v762_v6 = vmul.f32 0.70710677, %v650_v2  ;;  %v737_v44 = vmul.f32 0.5, %v650_v2 }
 0x1ed   :  { %v1443_v7 = vpop.eup %1442  ;;  %v1089_v8 = vmul.f32 -1.442695, %v833_v4  ;;  %v809_v10 = vadd.f32 1.0, %v1441_v5  ;;  %v654_v11 = vpop.f32.mrb[18].mxu1 }
 0x1ee   :  { %v930_v12 = vadd.f32 1.0, %v1443_v7  ;;  %1456 = verf.f32 %v762_v6  ;;  %v655_v13 = vadd.f32 %v1911_v59, %v654_v11  ;;  %v1302_v14 = vpop.f32.mrb[19].mxu1 }
 0x1ef   :  { %1458 = vpow2.f32 %v1089_v8  ;;  %v834_v15 = vmul.f32 %v809_v10, %v734_v9 }
 0x1f0   :  { %v1445_v16 = vpop.eup %1444  ;;  %1460 = vrcp.f32 %v930_v12  ;;  %v763_v17 = vmul.f32 0.70710677, %v655_v13  ;;  %v738_v56 = vmul.f32 0.5, %v655_v13 }
 0x1f1   :  { %v1447_v18 = vpop.eup %1446  ;;  %v1090_v19 = vmul.f32 -1.442695, %v834_v15  ;;  %v810_v21 = vadd.f32 1.0, %v1445_v16  ;;  %v659_v22 = vpop.f32.mrb[20].mxu1 }
 0x1f2   :  { %v1449_v23 = vpop.eup %1448  ;;  %v931_v24 = vadd.f32 1.0, %v1447_v18  ;;  %1462 = verf.f32 %v763_v17  ;;  %v660_v25 = vadd.f32 %v1911_v59, %v659_v22  ;;  %v1305_v26 = vpop.f32.mrb[21].mxu1 }
 0x1f3   :  { %1003 = vst.msk [vmem:[%s2043_s5] sm:$0xff] %vm56_vm1, %v1449_v23  ;;  %1464 = vpow2.f32 %v1090_v19  ;;  %v835_v27 = vmul.f32 %v810_v21, %v735_v20 }
 0x1f4   :  { %v1451_v28 = vpop.eup %1450  ;;  %1466 = vrcp.f32 %v931_v24  ;;  %v764_v29 = vmul.f32 0.70710677, %v660_v25  ;;  %v739_v5 = vmul.f32 0.5, %v660_v25 }
 0x1f5   :  { %v1453_v30 = vpop.eup %1452  ;;  %v1091_v31 = vmul.f32 -1.442695, %v835_v27  ;;  %v811_v33 = vadd.f32 1.0, %v1451_v28  ;;  %v664_v34 = vpop.f32.mrb[22].mxu1 }
 0x1f6   :  { %v1455_v35 = vpop.eup %1454  ;;  %v932_v36 = vadd.f32 1.0, %v1453_v30  ;;  %1468 = verf.f32 %v764_v29  ;;  %v665_v37 = vadd.f32 %v1911_v59, %v664_v34  ;;  %v1308_v38 = vpop.f32.mrb[23].mxu1 }
 0x1f7   :  { %1004 = vst.msk [vmem:[%s2043_s5 + $0x8] sm:$0xff] %vm56_vm1, %v1455_v35  ;;  %1470 = vpow2.f32 %v1091_v31  ;;  %v836_v39 = vmul.f32 %v811_v33, %v736_v32 }
 0x1f8   :  { %v1457_v40 = vpop.eup %1456  ;;  %1472 = vrcp.f32 %v932_v36  ;;  %v765_v41 = vmul.f32 0.70710677, %v665_v37  ;;  %v740_v17 = vmul.f32 0.5, %v665_v37 }
 0x1f9   :  { %v1459_v42 = vpop.eup %1458  ;;  %v1092_v43 = vmul.f32 -1.442695, %v836_v39  ;;  %v812_v46 = vadd.f32 1.0, %v1457_v40  ;;  %v669_v47 = vpop.f32.mrb[24].mxu1 }
 0x1fa   :  { %v1461_v48 = vpop.eup %1460  ;;  %v933_v49 = vadd.f32 1.0, %v1459_v42  ;;  %1474 = verf.f32 %v765_v41  ;;  %v670_v50 = vadd.f32 %v1911_v59, %v669_v47  ;;  %v1311_v45 = vpop.f32.mrb[25].mxu1 }
 0x1fb   :  { %1005 = vst.msk [vmem:[%s2043_s5 + $0x10] sm:$0xff] %vm56_vm1, %v1461_v48  ;;  %1476 = vpow2.f32 %v1092_v43  ;;  %v837_v51 = vmul.f32 %v812_v46, %v737_v44 }
 0x1fc   :  { %v1463_v52 = vpop.eup %1462  ;;  %1478 = vrcp.f32 %v933_v49  ;;  %v766_v53 = vmul.f32 0.70710677, %v670_v50  ;;  %v741_v29 = vmul.f32 0.5, %v670_v50 }
 0x1fd   :  { %v1465_v54 = vpop.eup %1464  ;;  %v1093_v55 = vmul.f32 -1.442695, %v837_v51  ;;  %v813_v57 = vadd.f32 1.0, %v1463_v52  ;;  %v674_v58 = vpop.f32.mrb[26].mxu1 }
 0x1fe   :  { %v1467_v60 = vpop.eup %1466  ;;  %v934_v61 = vadd.f32 1.0, %v1465_v54  ;;  %1480 = verf.f32 %v766_v53  ;;  %v675_v62 = vadd.f32 %v1911_v59, %v674_v58  ;;  %v1314_v63 = vpop.f32.mrb[27].mxu1 }
 0x1ff   :  { %1006 = vst.msk [vmem:[%s2043_s5 + $0x18] sm:$0xff] %vm56_vm1, %v1467_v60  ;;  %1482 = vpow2.f32 %v1093_v55  ;;  %v838_v0 = vmul.f32 %v813_v57, %v738_v56 }
 0x200   :  { %v1469_v1 = vpop.eup %1468  ;;  %1484 = vrcp.f32 %v934_v61  ;;  %v767_v2 = vmul.f32 0.70710677, %v675_v62  ;;  %v742_v41 = vmul.f32 0.5, %v675_v62 }
 0x201   :  { %v1471_v3 = vpop.eup %1470  ;;  %v1094_v4 = vmul.f32 -1.442695, %v838_v0  ;;  %v814_v6 = vadd.f32 1.0, %v1469_v1  ;;  %v679_v7 = vpop.f32.mrb[28].mxu1 }
 0x202   :  { %v1473_v8 = vpop.eup %1472  ;;  %v935_v9 = vadd.f32 1.0, %v1471_v3  ;;  %1486 = verf.f32 %v767_v2  ;;  %v680_v10 = vadd.f32 %v1911_v59, %v679_v7  ;;  %v1317_v11 = vpop.f32.mrb[29].mxu1 }
 0x203   :  { %1007 = vst.msk [vmem:[%s2043_s5 + $0x20] sm:$0xff] %vm56_vm1, %v1473_v8  ;;  %1488 = vpow2.f32 %v1094_v4  ;;  %v839_v12 = vmul.f32 %v814_v6, %v739_v5 }
 0x204   :  { %v1475_v13 = vpop.eup %1474  ;;  %1490 = vrcp.f32 %v935_v9  ;;  %v768_v14 = vmul.f32 0.70710677, %v680_v10  ;;  %v743_v53 = vmul.f32 0.5, %v680_v10 }
 0x205   :  { %v1477_v15 = vpop.eup %1476  ;;  %v1095_v16 = vmul.f32 -1.442695, %v839_v12  ;;  %v815_v18 = vadd.f32 1.0, %v1475_v13  ;;  %v684_v19 = vpop.f32.mrb[30].mxu1 }
 0x206   :  { %v1479_v20 = vpop.eup %1478  ;;  %v936_v21 = vadd.f32 1.0, %v1477_v15  ;;  %1492 = verf.f32 %v768_v14  ;;  %v685_v22 = vadd.f32 %v1911_v59, %v684_v19  ;;  %v1320_v23 = vpop.f32.mrb[31].mxu1 }
 0x207   :  { %1008 = vst.msk [vmem:[%s2043_s5 + $0x28] sm:$0xff] %vm56_vm1, %v1479_v20  ;;  %1494 = vpow2.f32 %v1095_v16  ;;  %v840_v24 = vmul.f32 %v815_v18, %v740_v17 }
 0x208   :  { %v1481_v25 = vpop.eup %1480  ;;  %1496 = vrcp.f32 %v936_v21  ;;  %v769_v26 = vmul.f32 0.70710677, %v685_v22  ;;  %v744_v2 = vmul.f32 0.5, %v685_v22 }
 0x209   :  { %v1483_v27 = vpop.eup %1482  ;;  %v1096_v28 = vmul.f32 -1.442695, %v840_v24  ;;  %v816_v30 = vadd.f32 1.0, %v1481_v25  ;;  %v689_v31 = vpop.f32.mrb[32].mxu1 }
 0x20a   :  { %v1485_v32 = vpop.eup %1484  ;;  %v937_v33 = vadd.f32 1.0, %v1483_v27  ;;  %1498 = verf.f32 %v769_v26  ;;  %v690_v34 = vadd.f32 %v1911_v59, %v689_v31  ;;  %v1323_v35 = vpop.f32.mrb[33].mxu1 }
 0x20b   :  { %1009 = vst.msk [vmem:[%s2043_s5 + $0x30] sm:$0xff] %vm56_vm1, %v1485_v32  ;;  %1500 = vpow2.f32 %v1096_v28  ;;  %v841_v36 = vmul.f32 %v816_v30, %v741_v29 }
 0x20c   :  { %v1487_v37 = vpop.eup %1486  ;;  %1502 = vrcp.f32 %v937_v33  ;;  %v770_v38 = vmul.f32 0.70710677, %v690_v34  ;;  %v745_v14 = vmul.f32 0.5, %v690_v34 }
 0x20d   :  { %v1489_v39 = vpop.eup %1488  ;;  %v1097_v40 = vmul.f32 -1.442695, %v841_v36  ;;  %v817_v42 = vadd.f32 1.0, %v1487_v37  ;;  %v694_v43 = vpop.f32.mrb[34].mxu1 }
 0x20e   :  { %v1491_v44 = vpop.eup %1490  ;;  %v938_v46 = vadd.f32 1.0, %v1489_v39  ;;  %1504 = verf.f32 %v770_v38  ;;  %v695_v47 = vadd.f32 %v1911_v59, %v694_v43  ;;  %v1326_v48 = vpop.f32.mrb[35].mxu1 }
 0x20f   :  { %1010 = vst.msk [vmem:[%s2043_s5 + $0x38] sm:$0xff] %vm56_vm1, %v1491_v44  ;;  %1506 = vpow2.f32 %v1097_v40  ;;  %v842_v49 = vmul.f32 %v817_v42, %v742_v41 }
 0x210   :  { %v1493_v50 = vpop.eup %1492  ;;  %1508 = vrcp.f32 %v938_v46  ;;  %v771_v45 = vmul.f32 0.70710677, %v695_v47  ;;  %v746_v26 = vmul.f32 0.5, %v695_v47 }
 0x211   :  { %v1495_v51 = vpop.eup %1494  ;;  %v1098_v52 = vmul.f32 -1.442695, %v842_v49  ;;  %v818_v54 = vadd.f32 1.0, %v1493_v50  ;;  %v699_v55 = vpop.f32.mrb[36].mxu1 }
 0x212   :  { %v1497_v56 = vpop.eup %1496  ;;  %v939_v57 = vadd.f32 1.0, %v1495_v51  ;;  %1510 = verf.f32 %v771_v45  ;;  %v700_v58 = vadd.f32 %v1911_v59, %v699_v55  ;;  %v1329_v60 = vpop.f32.mrb[37].mxu1 }
 0x213   :  { %1011 = vst.msk [vmem:[%s2043_s5 + $0x40] sm:$0xff] %vm56_vm1, %v1497_v56  ;;  %1512 = vpow2.f32 %v1098_v52  ;;  %v843_v61 = vmul.f32 %v818_v54, %v743_v53 }
 0x214   :  { %v1499_v62 = vpop.eup %1498  ;;  %1514 = vrcp.f32 %v939_v57  ;;  %v772_v63 = vmul.f32 0.70710677, %v700_v58  ;;  %v747_v38 = vmul.f32 0.5, %v700_v58 }
 0x215   :  { %v1501_v0 = vpop.eup %1500  ;;  %v1099_v1 = vmul.f32 -1.442695, %v843_v61  ;;  %v819_v3 = vadd.f32 1.0, %v1499_v62  ;;  %v704_v4 = vpop.f32.mrb[38].mxu1 }
 0x216   :  { %v1503_v5 = vpop.eup %1502  ;;  %v940_v6 = vadd.f32 1.0, %v1501_v0  ;;  %1516 = verf.f32 %v772_v63  ;;  %v705_v7 = vadd.f32 %v1911_v59, %v704_v4  ;;  %v1332_v8 = vpop.f32.mrb[39].mxu1 }
 0x217   :  { %1012 = vst.msk [vmem:[%s2043_s5 + $0x48] sm:$0xff] %vm56_vm1, %v1503_v5  ;;  %1518 = vpow2.f32 %v1099_v1  ;;  %v844_v9 = vmul.f32 %v819_v3, %v744_v2 }
 0x218   :  { %v1505_v10 = vpop.eup %1504  ;;  %1520 = vrcp.f32 %v940_v6  ;;  %v773_v11 = vmul.f32 0.70710677, %v705_v7  ;;  %v748_v45 = vmul.f32 0.5, %v705_v7 }
 0x219   :  { %v1507_v12 = vpop.eup %1506  ;;  %v1100_v13 = vmul.f32 -1.442695, %v844_v9  ;;  %v820_v15 = vadd.f32 1.0, %v1505_v10  ;;  %v709_v16 = vpop.f32.mrb[40].mxu1 }
 0x21a   :  { %v1509_v17 = vpop.eup %1508  ;;  %v941_v18 = vadd.f32 1.0, %v1507_v12  ;;  %1522 = verf.f32 %v773_v11  ;;  %v710_v19 = vadd.f32 %v1911_v59, %v709_v16  ;;  %v1335_v20 = vpop.f32.mrb[41].mxu1 }
 0x21b   :  { %1013 = vst.msk [vmem:[%s2043_s5 + $0x50] sm:$0xff] %vm56_vm1, %v1509_v17  ;;  %1524 = vpow2.f32 %v1100_v13  ;;  %v845_v21 = vmul.f32 %v820_v15, %v745_v14 }
 0x21c   :  { %v1511_v22 = vpop.eup %1510  ;;  %1526 = vrcp.f32 %v941_v18  ;;  %v774_v23 = vmul.f32 0.70710677, %v710_v19  ;;  %v749_v63 = vmul.f32 0.5, %v710_v19 }
 0x21d   :  { %v1513_v24 = vpop.eup %1512  ;;  %v1101_v25 = vmul.f32 -1.442695, %v845_v21  ;;  %v821_v27 = vadd.f32 1.0, %v1511_v22  ;;  %v714_v28 = vpop.f32.mrb[42].mxu1 }
 0x21e   :  { %v1515_v29 = vpop.eup %1514  ;;  %v942_v30 = vadd.f32 1.0, %v1513_v24  ;;  %1528 = verf.f32 %v774_v23  ;;  %v715_v31 = vadd.f32 %v1911_v59, %v714_v28  ;;  %v1338_v32 = vpop.f32.mrb[43].mxu1 }
 0x21f   :  { %1014 = vst.msk [vmem:[%s2043_s5 + $0x58] sm:$0xff] %vm56_vm1, %v1515_v29  ;;  %1530 = vpow2.f32 %v1101_v25  ;;  %v846_v33 = vmul.f32 %v821_v27, %v746_v26 }
 0x220   :  { %v1517_v34 = vpop.eup %1516  ;;  %1532 = vrcp.f32 %v942_v30  ;;  %v775_v35 = vmul.f32 0.70710677, %v715_v31  ;;  %v750_v6 = vmul.f32 0.5, %v715_v31 }
 0x221   :  { %v1519_v36 = vpop.eup %1518  ;;  %v1102_v37 = vmul.f32 -1.442695, %v846_v33  ;;  %v822_v39 = vadd.f32 1.0, %v1517_v34  ;;  %v719_v40 = vpop.f32.mrb[44].mxu1 }
 0x222   :  { %v1521_v41 = vpop.eup %1520  ;;  %v943_v42 = vadd.f32 1.0, %v1519_v36  ;;  %1534 = verf.f32 %v775_v35  ;;  %v720_v43 = vadd.f32 %v1911_v59, %v719_v40  ;;  %v1341_v44 = vpop.f32.mrb[45].mxu1 }
 0x223   :  { %1015 = vst.msk [vmem:[%s2043_s5 + $0x60] sm:$0xff] %vm56_vm1, %v1521_v41  ;;  %1536 = vpow2.f32 %v1102_v37  ;;  %v847_v46 = vmul.f32 %v822_v39, %v747_v38 }
 0x224   :  { %v1523_v47 = vpop.eup %1522  ;;  %1538 = vrcp.f32 %v943_v42  ;;  %v776_v48 = vmul.f32 0.70710677, %v720_v43  ;;  %v751_v14 = vmul.f32 0.5, %v720_v43 }
 0x225   :  { %v1525_v49 = vpop.eup %1524  ;;  %v1103_v50 = vmul.f32 -1.442695, %v847_v46  ;;  %v823_v51 = vadd.f32 1.0, %v1523_v47  ;;  %v724_v52 = vpop.f32.mrb[46].mxu1 }
 0x226   :  { %v1527_v53 = vpop.eup %1526  ;;  %v944_v54 = vadd.f32 1.0, %v1525_v49  ;;  %1540 = verf.f32 %v776_v48  ;;  %v725_v55 = vadd.f32 %v1911_v59, %v724_v52  ;;  %v1344_v56 = vpop.f32.mrb[47].mxu1 }
 0x227   :  { %1016 = vst.msk [vmem:[%s2043_s5 + $0x68] sm:$0xff] %vm56_vm1, %v1527_v53  ;;  %1542 = vpow2.f32 %v1103_v50  ;;  %v848_v57 = vmul.f32 %v823_v51, %v748_v45 }
 0x228   :  { %v1529_v58 = vpop.eup %1528  ;;  %1544 = vrcp.f32 %v944_v54  ;;  %v777_v60 = vmul.f32 0.70710677, %v725_v55  ;;  %v752_v22 = vmul.f32 0.5, %v725_v55 }
 0x229   :  { %v1531_v61 = vpop.eup %1530  ;;  %v1104_v62 = vmul.f32 -1.442695, %v848_v57  ;;  %v824_v0 = vadd.f32 1.0, %v1529_v58 }
 0x22a   :  { %v1533_v1 = vpop.eup %1532  ;;  %v945_v2 = vadd.f32 1.0, %v1531_v61  ;;  %1546 = verf.f32 %v777_v60 }
 0x22b   :  { %1017 = vst.msk [vmem:[%s2043_s5 + $0x70] sm:$0xff] %vm56_vm1, %v1533_v1  ;;  %1548 = vpow2.f32 %v1104_v62  ;;  %v849_v59 = vmul.f32 %v824_v0, %v749_v63 }
 0x22c   :  { %v1535_v3 = vpop.eup %1534  ;;  %1550 = vrcp.f32 %v945_v2 }
 0x22d   :  { %v1537_v4 = vpop.eup %1536  ;;  %v1105_v5 = vmul.f32 -1.442695, %v849_v59  ;;  %v825_v7 = vadd.f32 1.0, %v1535_v3 }
 0x22e   :  { %v1539_v8 = vpop.eup %1538  ;;  %v946_v9 = vadd.f32 1.0, %v1537_v4 }
 0x22f   :  { %1018 = vst.msk [vmem:[%s2043_s5 + $0x78] sm:$0xff] %vm56_vm1, %v1539_v8  ;;  %1552 = vpow2.f32 %v1105_v5  ;;  %v850_v10 = vmul.f32 %v825_v7, %v750_v6 }
 0x230   :  { %v1541_v11 = vpop.eup %1540  ;;  %1554 = vrcp.f32 %v946_v9 }
 0x231   :  { %v1543_v12 = vpop.eup %1542  ;;  %v1106_v13 = vmul.f32 -1.442695, %v850_v10  ;;  %v826_v15 = vadd.f32 1.0, %v1541_v11 }
 0x232   :  { %v1545_v16 = vpop.eup %1544  ;;  %v947_v17 = vadd.f32 1.0, %v1543_v12 }
 0x233   :  { %1019 = vst.msk [vmem:[%s2043_s5 + $0x80] sm:$0xff] %vm56_vm1, %v1545_v16  ;;  %1556 = vpow2.f32 %v1106_v13  ;;  %v851_v18 = vmul.f32 %v826_v15, %v751_v14 }
 0x234   :  { %v1547_v19 = vpop.eup %1546  ;;  %1558 = vrcp.f32 %v947_v17 }
 0x235   :  { %v1549_v20 = vpop.eup %1548  ;;  %v1107_v21 = vmul.f32 -1.442695, %v851_v18  ;;  %v827_v23 = vadd.f32 1.0, %v1547_v19 }
 0x236   :  { %v1551_v24 = vpop.eup %1550  ;;  %v948_v25 = vadd.f32 1.0, %v1549_v20 }
 0x237   :  { %1020 = vst.msk [vmem:[%s2043_s5 + $0x88] sm:$0xff] %vm56_vm1, %v1551_v24  ;;  %1560 = vpow2.f32 %v1107_v21  ;;  %v852_v26 = vmul.f32 %v827_v23, %v752_v22 }
 0x238   :  { %1562 = vrcp.f32 %v948_v25 }
 0x239   :  { %v1553_v27 = vpop.eup %1552  ;;  %v1108_v28 = vmul.f32 -1.442695, %v852_v26 }
 0x23a   :  { %v1555_v29 = vpop.eup %1554  ;;  %v949_v30 = vadd.f32 1.0, %v1553_v27 }
 0x23b   :  { %1021 = vst.msk [vmem:[%s2043_s5 + $0x90] sm:$0xff] %vm56_vm1, %v1555_v29  ;;  %1564 = vpow2.f32 %v1108_v28 }
 0x23c   :  { %1566 = vrcp.f32 %v949_v30 }
 0x23d   :  { %v1557_v31 = vpop.eup %1556 }
 0x23e   :  { %v1559_v32 = vpop.eup %1558  ;;  %v950_v33 = vadd.f32 1.0, %v1557_v31 }
 0x23f   :  { %1022 = vst.msk [vmem:[%s2043_s5 + $0x98] sm:$0xff] %vm56_vm1, %v1559_v32 }
 0x240   :  { %1568 = vrcp.f32 %v950_v33 }
 0x241   :  { %v1561_v34 = vpop.eup %1560 }
 0x242   :  { %v1563_v35 = vpop.eup %1562  ;;  %v951_v36 = vadd.f32 1.0, %v1561_v34 }
 0x243   :  { %1023 = vst.msk [vmem:[%s2043_s5 + $0xa0] sm:$0xff] %vm56_vm1, %v1563_v35 }
 0x244   :  { %1570 = vrcp.f32 %v951_v36 }
 0x245   :  { %v1565_v37 = vpop.eup %1564 }
 0x246   :  { %v1567_v38 = vpop.eup %1566  ;;  %v952_v39 = vadd.f32 1.0, %v1565_v37 }
 0x247   :  { %1024 = vst.msk [vmem:[%s2043_s5 + $0xa8] sm:$0xff] %vm56_vm1, %v1567_v38 }
 0x248   :  { %1572 = vrcp.f32 %v952_v39 }
 0x24a   :  { %v1569_v40 = vpop.eup %1568 }
 0x24b   :  { %1025 = vst.msk [vmem:[%s2043_s5 + $0xb0] sm:$0xff] %vm56_vm1, %v1569_v40 }
 0x24e   :  { %v1571_v41 = vpop.eup %1570 }
 0x24f   :  { %1026 = vst.msk [vmem:[%s2043_s5 + $0xb8] sm:$0xff] %vm56_vm1, %v1571_v41 }
 0x252   :  { %v1573_v42 = vpop.eup %1572 }
 0x253   :  { %1027 = vst.msk [vmem:[%s2043_s5 + $0xc0] sm:$0xff] %vm56_vm1, %v1573_v42 }

// kernel: tpu_custom_call.1
= control target key start
LH: loop header
LB: loop body
LE: loop exit
PB: predicated region body
PF: predicated region fallthrough
CT: control target
= control target key end

     0   :  { %v1574_v0 = vmov 0.0|0.0   ;;  %vm1575_vm0 = vmmov 0   ;;  %v1576_v4 = vmov 0.0   ;;  %vm56_vm1 = vcmask 261120   ;;  %s2038_s1 = inlined_call_operand.vmem [shape: f32[32,64], index: 1, kind: input, shape index: {}]   ;;  %s2039_s0 = inlined_call_operand.vmem [shape: f32[200,32], index: 0, kind: input, shape index: {}]   ;;  %s2040_s3 = inlined_call_operand.vmem [shape: f32[64,32], index: 3, kind: input, shape index: {}]   ;;  %s2041_s2 = inlined_call_operand.vmem [shape: f32[1,64], index: 2, kind: input, shape index: {}]   ;;  %s2042_s4 = inlined_call_operand.vmem [shape: f32[1,32], index: 4, kind: input, shape index: {}]   ;;  %s2043_s5 = inlined_call_operand.vmem [shape: f32[200,32], index: 5, kind: output, shape index: {}]  }
   0x1   :  { %1345 = vmatprep.subr.bf16.mxu0 %v1574_v0  ;;  %v45_v1 = vld [vmem:[%s2038_s1] sm:$0xff]  ;;  %v46_v2 = vld [vmem:[%s2038_s1 + $0x8] sm:$0xff]  ;;  %v47_v3 = vld [vmem:[%s2038_s1 + $0x10] sm:$0xff]  ;;  %1179 = vmatprep.mubr.msk.f32.mxu0 %vm1575_vm0, %v1576_v4  ;;  %vm462_vm2 = vcmask 523264  }
   0x2   :  { %v1346_v5 = vpack.c.bf16 %v46_v2, %v45_v1  ;;  %v48_v6 = vld [vmem:[%s2038_s1 + $0x18] sm:$0xff]  ;;  %1363 = vmatprep.subr.bf16.mxu1 %v1574_v0  ;;  %1273 = vmatprep.mubr.msk.f32.mxu1 %vm1575_vm0, %v1576_v4  ;;  %v20_v8 = vld [vmem:[%s2039_s0] sm:$0xff]  ;;  %v21_v9 = vld [vmem:[%s2039_s0 + $0x8] sm:$0xff] }
   0x3   :  { %v1349_v7 = vpack.c.bf16 %v48_v6, %v47_v3  ;;  %v22_v10 = vld [vmem:[%s2039_s0 + $0x10] sm:$0xff]  ;;  %v23_v11 = vld [vmem:[%s2039_s0 + $0x18] sm:$0xff]  ;;  %v24_v12 = vld [vmem:[%s2039_s0 + $0x20] sm:$0xff] }
   0x4   :  { %1347 = vmatpush3.bf16.msra.mxu0 %v1346_v5  ;;  %v25_v13 = vld [vmem:[%s2039_s0 + $0x28] sm:$0xff]  ;;  %v26_v14 = vld [vmem:[%s2039_s0 + $0x30] sm:$0xff]  ;;  %v27_v15 = vld [vmem:[%s2039_s0 + $0x38] sm:$0xff] }
   0x5   :  { %1348 = vmatprep.subr.bf16.mxu0 %v1574_v0  ;;  %v28_v16 = vld [vmem:[%s2039_s0 + $0x40] sm:$0xff]  ;;  %v29_v17 = vld [vmem:[%s2039_s0 + $0x48] sm:$0xff]  ;;  %v30_v18 = vld [vmem:[%s2039_s0 + $0x50] sm:$0xff] }
   0x6   :  { %v31_v19 = vld [vmem:[%s2039_s0 + $0x58] sm:$0xff]  ;;  %v32_v20 = vld [vmem:[%s2039_s0 + $0x60] sm:$0xff]  ;;  %v33_v21 = vld [vmem:[%s2039_s0 + $0x68] sm:$0xff] }
   0x7   :  { %v34_v22 = vld [vmem:[%s2039_s0 + $0x70] sm:$0xff]  ;;  %v35_v23 = vld [vmem:[%s2039_s0 + $0x78] sm:$0xff]  ;;  %v36_v24 = vld [vmem:[%s2039_s0 + $0x80] sm:$0xff] }
   0x8   :  { %1350 = vmatpush3.bf16.msra.mxu0 %v1349_v7  ;;  %v37_v25 = vld [vmem:[%s2039_s0 + $0x88] sm:$0xff]  ;;  %v38_v26 = vld [vmem:[%s2039_s0 + $0x90] sm:$0xff]  ;;  %v39_v27 = vld [vmem:[%s2039_s0 + $0x98] sm:$0xff] }
   0x9   :  { %1351 = vmatprep.subr.bf16.mxu0 %v1574_v0  ;;  %v40_v28 = vld [vmem:[%s2039_s0 + $0xa0] sm:$0xff]  ;;  %v41_v29 = vld [vmem:[%s2039_s0 + $0xa8] sm:$0xff]  ;;  %v42_v30 = vld [vmem:[%s2039_s0 + $0xb0] sm:$0xff] }
   0xa   :  { %v447_v31 = vld [vmem:[%s2040_s3] sm:$0xff]  ;;  %v448_v32 = vld [vmem:[%s2040_s3 + $0x8] sm:$0xff]  ;;  %v43_v34 = vld [vmem:[%s2039_s0 + $0xb8] sm:$0xff] }
   0xb   :  { %1180 = vmatmul.mubr.msk.f32.vlgmr.msra.gmra.mrb[0].mxu0 %vm56_vm1, %v20_v8  ;;  %v1352_v33 = vpack.c.bf16 %v448_v32, %v447_v31  ;;  %v449_v35 = vld [vmem:[%s2040_s3 + $0x10] sm:$0xff]  ;;  %v450_v36 = vld [vmem:[%s2040_s3 + $0x18] sm:$0xff]  ;;  %v44_v38 = vld [vmem:[%s2039_s0 + $0xc0] sm:$0xff] }
   0xc   :  { %1182 = vmatprep.mubr.msk.f32.mxu0 %vm1575_vm0, %v1576_v4  ;;  %v1355_v37 = vpack.c.bf16 %v450_v36, %v449_v35  ;;  %v451_v39 = vld [vmem:[%s2040_s3 + $0x20] sm:$0xff]  ;;  %v452_v40 = vld [vmem:[%s2040_s3 + $0x28] sm:$0xff]  ;;  %v453_v42 = vld [vmem:[%s2040_s3 + $0x30] sm:$0xff] }
   0xd   :  { %1367 = vmatpush3.bf16.msra.mxu1 %v1352_v33  ;;  %1353 = vmatpush3.bf16.msra.mxu0 %v1352_v33  ;;  %v1358_v41 = vpack.c.bf16 %v452_v40, %v451_v39  ;;  %v454_v43 = vld [vmem:[%s2040_s3 + $0x38] sm:$0xff]  ;;  %v1810_v45 = vld [vmem:[%s2041_s2] ss:$0 sm:$0xff] }
   0xe   :  { %1354 = vmatprep.subr.bf16.mxu0 %v1574_v0  ;;  %1364 = vmatprep.subr.bf16.mxu1 %v1574_v0  ;;  %v1361_v44 = vpack.c.bf16 %v454_v43, %v453_v42 }
   0xf   :  { %1183 = vmatmul.mubr.msk.f32.gmra.mrb[2].mxu0 %vm56_vm1, %v21_v9 }
  0x10   :  { %1185 = vmatprep.mubr.msk.f32.mxu0 %vm1575_vm0, %v1576_v4 }
  0x11   :  { %1368 = vmatpush3.bf16.msra.mxu1 %v1355_v37  ;;  %1356 = vmatpush3.bf16.msra.mxu0 %v1355_v37 }
  0x12   :  { %1357 = vmatprep.subr.bf16.mxu0 %v1574_v0  ;;  %1365 = vmatprep.subr.bf16.mxu1 %v1574_v0 }
  0x13   :  { %1186 = vmatmul.mubr.msk.f32.gmra.mrb[4].mxu0 %vm56_vm1, %v22_v10 }
  0x14   :  { %1188 = vmatprep.mubr.msk.f32.mxu0 %vm1575_vm0, %v1576_v4 }
  0x15   :  { %1369 = vmatpush3.bf16.msra.mxu1 %v1358_v41  ;;  %1359 = vmatpush3.bf16.msra.mxu0 %v1358_v41 }
  0x16   :  { %1360 = vmatprep.subr.bf16.mxu0 %v1574_v0  ;;  %1366 = vmatprep.subr.bf16.mxu1 %v1574_v0 }
  0x17   :  { %1189 = vmatmul.mubr.msk.f32.gmra.mrb[6].mxu0 %vm56_vm1, %v23_v11 }
  0x18   :  { %1191 = vmatprep.mubr.msk.f32.mxu0 %vm1575_vm0, %v1576_v4 }
  0x19   :  { %1370 = vmatpush3.bf16.msra.mxu1 %v1361_v44  ;;  %1362 = vmatpush3.bf16.msra.mxu0 %v1361_v44 }
  0x1b   :  { %1192 = vmatmul.mubr.msk.f32.gmra.mrb[8].mxu0 %vm56_vm1, %v24_v12 }
  0x1c   :  { %1194 = vmatprep.mubr.msk.f32.mxu0 %vm1575_vm0, %v1576_v4 }
  0x1f   :  { %1195 = vmatmul.mubr.msk.f32.gmra.mrb[10].mxu0 %vm56_vm1, %v25_v13 }
  0x20   :  { %1197 = vmatprep.mubr.msk.f32.mxu0 %vm1575_vm0, %v1576_v4 }
  0x23   :  { %1198 = vmatmul.mubr.msk.f32.gmra.mrb[12].mxu0 %vm56_vm1, %v26_v14 }
  0x24   :  { %1200 = vmatprep.mubr.msk.f32.mxu0 %vm1575_vm0, %v1576_v4 }
  0x27   :  { %1201 = vmatmul.mubr.msk.f32.gmra.mrb[14].mxu0 %vm56_vm1, %v27_v15 }
  0x28   :  { %1203 = vmatprep.mubr.msk.f32.mxu0 %vm1575_vm0, %v1576_v4 }
  0x2b   :  { %1204 = vmatmul.mubr.msk.f32.gmra.mrb[16].mxu0 %vm56_vm1, %v28_v16 }
  0x2c   :  { %1206 = vmatprep.mubr.msk.f32.mxu0 %vm1575_vm0, %v1576_v4 }
  0x2f   :  { %1207 = vmatmul.mubr.msk.f32.gmra.mrb[18].mxu0 %vm56_vm1, %v29_v17 }
  0x30   :  { %1209 = vmatprep.mubr.msk.f32.mxu0 %vm1575_vm0, %v1576_v4 }
  0x33   :  { %1210 = vmatmul.mubr.msk.f32.gmra.mrb[20].mxu0 %vm56_vm1, %v30_v18 }
  0x34   :  { %1212 = vmatprep.mubr.msk.f32.mxu0 %vm1575_vm0, %v1576_v4 }
  0x37   :  { %1213 = vmatmul.mubr.msk.f32.gmra.mrb[22].mxu0 %vm56_vm1, %v31_v19 }
  0x38   :  { %1215 = vmatprep.mubr.msk.f32.mxu0 %vm1575_vm0, %v1576_v4 }
  0x3b   :  { %1216 = vmatmul.mubr.msk.f32.gmra.mrb[24].mxu0 %vm56_vm1, %v32_v20 }
  0x3c   :  { %1218 = vmatprep.mubr.msk.f32.mxu0 %vm1575_vm0, %v1576_v4 }
  0x3f   :  { %1219 = vmatmul.mubr.msk.f32.gmra.mrb[26].mxu0 %vm56_vm1, %v33_v21 }
  0x40   :  { %1221 = vmatprep.mubr.msk.f32.mxu0 %vm1575_vm0, %v1576_v4 }
  0x43   :  { %1222 = vmatmul.mubr.msk.f32.gmra.mrb[28].mxu0 %vm56_vm1, %v34_v22 }
  0x44   :  { %1224 = vmatprep.mubr.msk.f32.mxu0 %vm1575_vm0, %v1576_v4 }
  0x47   :  { %1225 = vmatmul.mubr.msk.f32.gmra.mrb[30].mxu0 %vm56_vm1, %v35_v23 }
  0x48   :  { %1227 = vmatprep.mubr.msk.f32.mxu0 %vm1575_vm0, %v1576_v4 }
  0x4b   :  { %1228 = vmatmul.mubr.msk.f32.gmra.mrb[32].mxu0 %vm56_vm1, %v36_v24 }
  0x4c   :  { %1230 = vmatprep.mubr.msk.f32.mxu0 %vm1575_vm0, %v1576_v4 }
  0x4f   :  { %1231 = vmatmul.mubr.msk.f32.gmra.mrb[34].mxu0 %vm56_vm1, %v37_v25 }
  0x50   :  { %1233 = vmatprep.mubr.msk.f32.mxu0 %vm1575_vm0, %v1576_v4 }
  0x53   :  { %1234 = vmatmul.mubr.msk.f32.gmra.mrb[36].mxu0 %vm56_vm1, %v38_v26 }
  0x54   :  { %1236 = vmatprep.mubr.msk.f32.mxu0 %vm1575_vm0, %v1576_v4 }
  0x57   :  { %1237 = vmatmul.mubr.msk.f32.gmra.mrb[38].mxu0 %vm56_vm1, %v39_v27 }
  0x58   :  { %1239 = vmatprep.mubr.msk.f32.mxu0 %vm1575_vm0, %v1576_v4 }
  0x5b   :  { %1240 = vmatmul.mubr.msk.f32.gmra.mrb[40].mxu0 %vm56_vm1, %v40_v28 }
  0x5c   :  { %1242 = vmatprep.mubr.msk.f32.mxu0 %vm1575_vm0, %v1576_v4 }
  0x5f   :  { %1243 = vmatmul.mubr.msk.f32.gmra.mrb[42].mxu0 %vm56_vm1, %v41_v29 }
  0x60   :  { %1245 = vmatprep.mubr.msk.f32.mxu0 %vm1575_vm0, %v1576_v4 }
  0x63   :  { %1246 = vmatmul.mubr.msk.f32.gmra.mrb[44].mxu0 %vm56_vm1, %v42_v30 }
  0x64   :  { %1248 = vmatprep.mubr.msk.f32.mxu0 %vm1575_vm0, %v1576_v4 }
  0x67   :  { %1249 = vmatmul.mubr.msk.f32.gmra.mrb[46].mxu0 %vm56_vm1, %v43_v34 }
  0x68   :  { %1251 = vmatprep.mubr.msk.f32.mxu0 %vm1575_vm0, %v1576_v4 }
  0x6b   :  { %1252 = vmatmul.mubr.msk.f32.gmra.mrb[48].mxu0 %vm56_vm1, %v44_v38 }
  0x6c   :  { %1270 = vmatprep.mubr.msk.f32.mxu0 %vm1575_vm0, %v1576_v4 }
  0xde   :  { %v198_v46 = vpop.f32.mrb[0].mxu0 }
  0xdf   :  { %v199_v47 = vadd.f32 %v1810_v45, %v198_v46  ;;  %v1181_v48 = vpop.f32.mrb[1].mxu0 }
  0xe1   :  { %v347_v49 = vmul.f32 0.70710677, %v199_v47  ;;  %v322_v63 = vmul.f32 0.5, %v199_v47 }
  0xe2   :  { %v203_v50 = vpop.f32.mrb[2].mxu0 }
  0xe3   :  { %1374 = verf.f32 %v347_v49  ;;  %v204_v51 = vadd.f32 %v1810_v45, %v203_v50  ;;  %v1184_v52 = vpop.f32.mrb[3].mxu0 }
  0xe5   :  { %v348_v53 = vmul.f32 0.70710677, %v204_v51  ;;  %v323_v8 = vmul.f32 0.5, %v204_v51 }
  0xe6   :  { %v208_v54 = vpop.f32.mrb[4].mxu0 }
  0xe7   :  { %1376 = verf.f32 %v348_v53  ;;  %v209_v55 = vadd.f32 %v1810_v45, %v208_v54  ;;  %v1187_v56 = vpop.f32.mrb[5].mxu0 }
  0xe9   :  { %v349_v57 = vmul.f32 0.70710677, %v209_v55  ;;  %v324_v16 = vmul.f32 0.5, %v209_v55 }
  0xea   :  { %v213_v58 = vpop.f32.mrb[6].mxu0 }
  0xeb   :  { %1378 = verf.f32 %v349_v57  ;;  %v214_v59 = vadd.f32 %v1810_v45, %v213_v58  ;;  %v1190_v60 = vpop.f32.mrb[7].mxu0 }
  0xed   :  { %v1375_v61 = vpop.eup %1374  ;;  %v350_v62 = vmul.f32 0.70710677, %v214_v59  ;;  %v325_v24 = vmul.f32 0.5, %v214_v59 }
  0xee   :  { %v397_v0 = vadd.f32 1.0, %v1375_v61  ;;  %v218_v1 = vpop.f32.mrb[8].mxu0 }
  0xef   :  { %1380 = verf.f32 %v350_v62  ;;  %v219_v2 = vadd.f32 %v1810_v45, %v218_v1  ;;  %v1193_v3 = vpop.f32.mrb[9].mxu0 }
  0xf0   :  { %v422_v5 = vmul.f32 %v397_v0, %v322_v63 }
  0xf1   :  { %v1377_v6 = vpop.eup %1376  ;;  %v351_v7 = vmul.f32 0.70710677, %v219_v2  ;;  %v326_v32 = vmul.f32 0.5, %v219_v2 }
  0xf2   :  { %v398_v9 = vadd.f32 1.0, %v1377_v6  ;;  %v223_v10 = vpop.f32.mrb[10].mxu0  ;;  %1271 = vmatmul.mubr.msk.f32.vlgmr.msra.gmra.mrb[50].mxu0 %vm462_vm2, %v422_v5 }
  0xf3   :  { %1382 = verf.f32 %v351_v7  ;;  %v224_v11 = vadd.f32 %v1810_v45, %v223_v10  ;;  %v1196_v12 = vpop.f32.mrb[11].mxu0 }
  0xf4   :  { %v423_v13 = vmul.f32 %v398_v9, %v323_v8 }
  0xf5   :  { %v1379_v14 = vpop.eup %1378  ;;  %v352_v15 = vmul.f32 0.70710677, %v224_v11  ;;  %v327_v40 = vmul.f32 0.5, %v224_v11 }
  0xf6   :  { %v399_v17 = vadd.f32 1.0, %v1379_v14  ;;  %v228_v18 = vpop.f32.mrb[12].mxu0  ;;  %1274 = vmatmul.mubr.msk.f32.vlgmr.msra.gmra.mrb[0].mxu1 %vm462_vm2, %v423_v13 }
  0xf7   :  { %1384 = verf.f32 %v352_v15  ;;  %v229_v19 = vadd.f32 %v1810_v45, %v228_v18  ;;  %v1199_v20 = vpop.f32.mrb[13].mxu0  ;;  %1276 = vmatprep.mubr.msk.f32.mxu1 %vm1575_vm0, %v1576_v4 }
  0xf8   :  { %v424_v21 = vmul.f32 %v399_v17, %v324_v16 }
  0xf9   :  { %v1381_v22 = vpop.eup %1380  ;;  %v353_v23 = vmul.f32 0.70710677, %v229_v19  ;;  %v328_v49 = vmul.f32 0.5, %v229_v19 }
  0xfa   :  { %v400_v25 = vadd.f32 1.0, %v1381_v22  ;;  %v233_v26 = vpop.f32.mrb[14].mxu0  ;;  %1277 = vmatmul.mubr.msk.f32.gmra.mrb[2].mxu1 %vm462_vm2, %v424_v21 }
  0xfb   :  { %1386 = verf.f32 %v353_v23  ;;  %v234_v27 = vadd.f32 %v1810_v45, %v233_v26  ;;  %v1202_v28 = vpop.f32.mrb[15].mxu0  ;;  %1279 = vmatprep.mubr.msk.f32.mxu1 %vm1575_vm0, %v1576_v4 }
  0xfc   :  { %v425_v29 = vmul.f32 %v400_v25, %v325_v24 }
  0xfd   :  { %v1383_v30 = vpop.eup %1382  ;;  %v354_v31 = vmul.f32 0.70710677, %v234_v27  ;;  %v329_v57 = vmul.f32 0.5, %v234_v27 }
  0xfe   :  { %v401_v33 = vadd.f32 1.0, %v1383_v30  ;;  %v238_v34 = vpop.f32.mrb[16].mxu0  ;;  %1280 = vmatmul.mubr.msk.f32.gmra.mrb[4].mxu1 %vm462_vm2, %v425_v29 }
  0xff   :  { %1388 = verf.f32 %v354_v31  ;;  %v239_v35 = vadd.f32 %v1810_v45, %v238_v34  ;;  %v1205_v36 = vpop.f32.mrb[17].mxu0  ;;  %1282 = vmatprep.mubr.msk.f32.mxu1 %vm1575_vm0, %v1576_v4 }
 0x100   :  { %v426_v37 = vmul.f32 %v401_v33, %v326_v32 }
 0x101   :  { %v1385_v38 = vpop.eup %1384  ;;  %v355_v39 = vmul.f32 0.70710677, %v239_v35  ;;  %v330_v1 = vmul.f32 0.5, %v239_v35 }
 0x102   :  { %v402_v41 = vadd.f32 1.0, %v1385_v38  ;;  %v243_v42 = vpop.f32.mrb[18].mxu0  ;;  %1283 = vmatmul.mubr.msk.f32.gmra.mrb[6].mxu1 %vm462_vm2, %v426_v37 }
 0x103   :  { %1390 = verf.f32 %v355_v39  ;;  %v244_v43 = vadd.f32 %v1810_v45, %v243_v42  ;;  %v1208_v44 = vpop.f32.mrb[19].mxu0  ;;  %1285 = vmatprep.mubr.msk.f32.mxu1 %vm1575_vm0, %v1576_v4 }
 0x104   :  { %v427_v46 = vmul.f32 %v402_v41, %v327_v40 }
 0x105   :  { %v1387_v47 = vpop.eup %1386  ;;  %v356_v48 = vmul.f32 0.70710677, %v244_v43  ;;  %v331_v10 = vmul.f32 0.5, %v244_v43 }
 0x106   :  { %v403_v50 = vadd.f32 1.0, %v1387_v47  ;;  %v248_v51 = vpop.f32.mrb[20].mxu0  ;;  %1286 = vmatmul.mubr.msk.f32.gmra.mrb[8].mxu1 %vm462_vm2, %v427_v46 }
 0x107   :  { %1392 = verf.f32 %v356_v48  ;;  %v249_v52 = vadd.f32 %v1810_v45, %v248_v51  ;;  %v1211_v53 = vpop.f32.mrb[21].mxu0  ;;  %1288 = vmatprep.mubr.msk.f32.mxu1 %vm1575_vm0, %v1576_v4 }
 0x108   :  { %v428_v54 = vmul.f32 %v403_v50, %v328_v49 }
 0x109   :  { %v1389_v55 = vpop.eup %1388  ;;  %v357_v56 = vmul.f32 0.70710677, %v249_v52  ;;  %v332_v18 = vmul.f32 0.5, %v249_v52 }
 0x10a   :  { %v404_v58 = vadd.f32 1.0, %v1389_v55  ;;  %v253_v59 = vpop.f32.mrb[22].mxu0  ;;  %1289 = vmatmul.mubr.msk.f32.gmra.mrb[10].mxu1 %vm462_vm2, %v428_v54 }
 0x10b   :  { %1394 = verf.f32 %v357_v56  ;;  %v254_v60 = vadd.f32 %v1810_v45, %v253_v59  ;;  %v1214_v61 = vpop.f32.mrb[23].mxu0  ;;  %1291 = vmatprep.mubr.msk.f32.mxu1 %vm1575_vm0, %v1576_v4 }
 0x10c   :  { %v429_v62 = vmul.f32 %v404_v58, %v329_v57 }
 0x10d   :  { %v1391_v63 = vpop.eup %1390  ;;  %v358_v0 = vmul.f32 0.70710677, %v254_v60  ;;  %v333_v26 = vmul.f32 0.5, %v254_v60 }
 0x10e   :  { %v405_v2 = vadd.f32 1.0, %v1391_v63  ;;  %v258_v3 = vpop.f32.mrb[24].mxu0  ;;  %1292 = vmatmul.mubr.msk.f32.gmra.mrb[12].mxu1 %vm462_vm2, %v429_v62 }
 0x10f   :  { %1396 = verf.f32 %v358_v0  ;;  %v259_v5 = vadd.f32 %v1810_v45, %v258_v3  ;;  %v1217_v6 = vpop.f32.mrb[25].mxu0  ;;  %1294 = vmatprep.mubr.msk.f32.mxu1 %vm1575_vm0, %v1576_v4 }
 0x110   :  { %v430_v7 = vmul.f32 %v405_v2, %v330_v1 }
 0x111   :  { %v1393_v8 = vpop.eup %1392  ;;  %v359_v9 = vmul.f32 0.70710677, %v259_v5  ;;  %v334_v34 = vmul.f32 0.5, %v259_v5 }
 0x112   :  { %v406_v11 = vadd.f32 1.0, %v1393_v8  ;;  %v263_v12 = vpop.f32.mrb[26].mxu0  ;;  %1295 = vmatmul.mubr.msk.f32.gmra.mrb[14].mxu1 %vm462_vm2, %v430_v7 }
 0x113   :  { %1398 = verf.f32 %v359_v9  ;;  %v264_v13 = vadd.f32 %v1810_v45, %v263_v12  ;;  %v1220_v14 = vpop.f32.mrb[27].mxu0  ;;  %1297 = vmatprep.mubr.msk.f32.mxu1 %vm1575_vm0, %v1576_v4 }
 0x114   :  { %v431_v15 = vmul.f32 %v406_v11, %v331_v10 }
 0x115   :  { %v1395_v16 = vpop.eup %1394  ;;  %v360_v17 = vmul.f32 0.70710677, %v264_v13  ;;  %v335_v42 = vmul.f32 0.5, %v264_v13 }
 0x116   :  { %v407_v19 = vadd.f32 1.0, %v1395_v16  ;;  %v268_v20 = vpop.f32.mrb[28].mxu0  ;;  %1298 = vmatmul.mubr.msk.f32.gmra.mrb[16].mxu1 %vm462_vm2, %v431_v15 }
 0x117   :  { %1400 = verf.f32 %v360_v17  ;;  %v269_v21 = vadd.f32 %v1810_v45, %v268_v20  ;;  %v1223_v22 = vpop.f32.mrb[29].mxu0  ;;  %1300 = vmatprep.mubr.msk.f32.mxu1 %vm1575_vm0, %v1576_v4 }
 0x118   :  { %v432_v23 = vmul.f32 %v407_v19, %v332_v18 }
 0x119   :  { %v1397_v24 = vpop.eup %1396  ;;  %v361_v25 = vmul.f32 0.70710677, %v269_v21  ;;  %v336_v51 = vmul.f32 0.5, %v269_v21 }
 0x11a   :  { %v408_v27 = vadd.f32 1.0, %v1397_v24  ;;  %v273_v28 = vpop.f32.mrb[30].mxu0  ;;  %1301 = vmatmul.mubr.msk.f32.gmra.mrb[18].mxu1 %vm462_vm2, %v432_v23 }
 0x11b   :  { %1402 = verf.f32 %v361_v25  ;;  %v274_v29 = vadd.f32 %v1810_v45, %v273_v28  ;;  %v1226_v30 = vpop.f32.mrb[31].mxu0  ;;  %1303 = vmatprep.mubr.msk.f32.mxu1 %vm1575_vm0, %v1576_v4 }
 0x11c   :  { %v433_v31 = vmul.f32 %v408_v27, %v333_v26 }
 0x11d   :  { %v1399_v32 = vpop.eup %1398  ;;  %v362_v33 = vmul.f32 0.70710677, %v274_v29  ;;  %v337_v59 = vmul.f32 0.5, %v274_v29 }
 0x11e   :  { %v409_v35 = vadd.f32 1.0, %v1399_v32  ;;  %v278_v36 = vpop.f32.mrb[32].mxu0  ;;  %1304 = vmatmul.mubr.msk.f32.gmra.mrb[20].mxu1 %vm462_vm2, %v433_v31 }
 0x11f   :  { %1404 = verf.f32 %v362_v33  ;;  %v279_v37 = vadd.f32 %v1810_v45, %v278_v36  ;;  %v1229_v38 = vpop.f32.mrb[33].mxu0  ;;  %1306 = vmatprep.mubr.msk.f32.mxu1 %vm1575_vm0, %v1576_v4 }
 0x120   :  { %v434_v39 = vmul.f32 %v409_v35, %v334_v34 }
 0x121   :  { %v1401_v40 = vpop.eup %1400  ;;  %v363_v41 = vmul.f32 0.70710677, %v279_v37  ;;  %v338_v3 = vmul.f32 0.5, %v279_v37 }
 0x122   :  { %v410_v43 = vadd.f32 1.0, %v1401_v40  ;;  %v283_v44 = vpop.f32.mrb[34].mxu0  ;;  %1307 = vmatmul.mubr.msk.f32.gmra.mrb[22].mxu1 %vm462_vm2, %v434_v39 }
 0x123   :  { %1406 = verf.f32 %v363_v41  ;;  %v284_v46 = vadd.f32 %v1810_v45, %v283_v44  ;;  %v1232_v47 = vpop.f32.mrb[35].mxu0  ;;  %1309 = vmatprep.mubr.msk.f32.mxu1 %vm1575_vm0, %v1576_v4 }
 0x124   :  { %v435_v48 = vmul.f32 %v410_v43, %v335_v42 }
 0x125   :  { %v1403_v49 = vpop.eup %1402  ;;  %v364_v50 = vmul.f32 0.70710677, %v284_v46  ;;  %v339_v12 = vmul.f32 0.5, %v284_v46 }
 0x126   :  { %v411_v52 = vadd.f32 1.0, %v1403_v49  ;;  %v288_v53 = vpop.f32.mrb[36].mxu0  ;;  %1310 = vmatmul.mubr.msk.f32.gmra.mrb[24].mxu1 %vm462_vm2, %v435_v48 }
 0x127   :  { %1408 = verf.f32 %v364_v50  ;;  %v289_v54 = vadd.f32 %v1810_v45, %v288_v53  ;;  %v1235_v55 = vpop.f32.mrb[37].mxu0  ;;  %1312 = vmatprep.mubr.msk.f32.mxu1 %vm1575_vm0, %v1576_v4 }
 0x128   :  { %v436_v56 = vmul.f32 %v411_v52, %v336_v51 }
 0x129   :  { %v1405_v57 = vpop.eup %1404  ;;  %v365_v58 = vmul.f32 0.70710677, %v289_v54  ;;  %v340_v20 = vmul.f32 0.5, %v289_v54 }
 0x12a   :  { %v412_v60 = vadd.f32 1.0, %v1405_v57  ;;  %v293_v61 = vpop.f32.mrb[38].mxu0  ;;  %1313 = vmatmul.mubr.msk.f32.gmra.mrb[26].mxu1 %vm462_vm2, %v436_v56 }
 0x12b   :  { %1410 = verf.f32 %v365_v58  ;;  %v294_v62 = vadd.f32 %v1810_v45, %v293_v61  ;;  %v1238_v63 = vpop.f32.mrb[39].mxu0  ;;  %1315 = vmatprep.mubr.msk.f32.mxu1 %vm1575_vm0, %v1576_v4 }
 0x12c   :  { %v437_v0 = vmul.f32 %v412_v60, %v337_v59  ;;  %v1911_v59 = vld [vmem:[%s2042_s4] ss:$0 sm:$0xff] }
 0x12d   :  { %v1407_v1 = vpop.eup %1406  ;;  %v366_v2 = vmul.f32 0.70710677, %v294_v62  ;;  %v341_v28 = vmul.f32 0.5, %v294_v62 }
 0x12e   :  { %v413_v5 = vadd.f32 1.0, %v1407_v1  ;;  %v298_v6 = vpop.f32.mrb[40].mxu0  ;;  %1316 = vmatmul.mubr.msk.f32.gmra.mrb[28].mxu1 %vm462_vm2, %v437_v0 }
 0x12f   :  { %1412 = verf.f32 %v366_v2  ;;  %v299_v7 = vadd.f32 %v1810_v45, %v298_v6  ;;  %v1241_v8 = vpop.f32.mrb[41].mxu0  ;;  %1318 = vmatprep.mubr.msk.f32.mxu1 %vm1575_vm0, %v1576_v4 }
 0x130   :  { %v438_v9 = vmul.f32 %v413_v5, %v338_v3 }
 0x131   :  { %v1409_v10 = vpop.eup %1408  ;;  %v367_v11 = vmul.f32 0.70710677, %v299_v7  ;;  %v342_v36 = vmul.f32 0.5, %v299_v7 }
 0x132   :  { %v414_v13 = vadd.f32 1.0, %v1409_v10  ;;  %v303_v14 = vpop.f32.mrb[42].mxu0  ;;  %1319 = vmatmul.mubr.msk.f32.gmra.mrb[30].mxu1 %vm462_vm2, %v438_v9 }
 0x133   :  { %1414 = verf.f32 %v367_v11  ;;  %v304_v15 = vadd.f32 %v1810_v45, %v303_v14  ;;  %v1244_v16 = vpop.f32.mrb[43].mxu0  ;;  %1321 = vmatprep.mubr.msk.f32.mxu1 %vm1575_vm0, %v1576_v4 }
 0x134   :  { %v439_v17 = vmul.f32 %v414_v13, %v339_v12 }
 0x135   :  { %v1411_v18 = vpop.eup %1410  ;;  %v368_v19 = vmul.f32 0.70710677, %v304_v15  ;;  %v343_v44 = vmul.f32 0.5, %v304_v15 }
 0x136   :  { %v415_v21 = vadd.f32 1.0, %v1411_v18  ;;  %v308_v22 = vpop.f32.mrb[44].mxu0  ;;  %1322 = vmatmul.mubr.msk.f32.gmra.mrb[32].mxu1 %vm462_vm2, %v439_v17 }
 0x137   :  { %1416 = verf.f32 %v368_v19  ;;  %v309_v23 = vadd.f32 %v1810_v45, %v308_v22  ;;  %v1247_v24 = vpop.f32.mrb[45].mxu0  ;;  %1324 = vmatprep.mubr.msk.f32.mxu1 %vm1575_vm0, %v1576_v4 }
 0x138   :  { %v440_v25 = vmul.f32 %v415_v21, %v340_v20 }
 0x139   :  { %v1413_v26 = vpop.eup %1412  ;;  %v369_v27 = vmul.f32 0.70710677, %v309_v23  ;;  %v344_v49 = vmul.f32 0.5, %v309_v23 }
 0x13a   :  { %v416_v29 = vadd.f32 1.0, %v1413_v26  ;;  %v313_v30 = vpop.f32.mrb[46].mxu0  ;;  %1325 = vmatmul.mubr.msk.f32.gmra.mrb[34].mxu1 %vm462_vm2, %v440_v25 }
 0x13b   :  { %1418 = verf.f32 %v369_v27  ;;  %v314_v31 = vadd.f32 %v1810_v45, %v313_v30  ;;  %v1250_v32 = vpop.f32.mrb[47].mxu0  ;;  %1327 = vmatprep.mubr.msk.f32.mxu1 %vm1575_vm0, %v1576_v4 }
 0x13c   :  { %v441_v33 = vmul.f32 %v416_v29, %v341_v28 }
 0x13d   :  { %v1415_v34 = vpop.eup %1414  ;;  %v370_v35 = vmul.f32 0.70710677, %v314_v31  ;;  %v345_v52 = vmul.f32 0.5, %v314_v31 }
 0x13e   :  { %v417_v37 = vadd.f32 1.0, %v1415_v34  ;;  %v318_v38 = vpop.f32.mrb[48].mxu0  ;;  %1328 = vmatmul.mubr.msk.f32.gmra.mrb[36].mxu1 %vm462_vm2, %v441_v33 }
 0x13f   :  { %1420 = verf.f32 %v370_v35  ;;  %v319_v39 = vadd.f32 %v1810_v45, %v318_v38  ;;  %v1253_v40 = vpop.f32.mrb[49].mxu0  ;;  %1330 = vmatprep.mubr.msk.f32.mxu1 %vm1575_vm0, %v1576_v4 }
 0x140   :  { %v442_v41 = vmul.f32 %v417_v37, %v342_v36 }
 0x141   :  { %v1417_v42 = vpop.eup %1416  ;;  %v371_v43 = vmul.f32 0.70710677, %v319_v39  ;;  %v346_v56 = vmul.f32 0.5, %v319_v39 }
 0x142   :  { %v418_v46 = vadd.f32 1.0, %v1417_v42  ;;  %1331 = vmatmul.mubr.msk.f32.gmra.mrb[38].mxu1 %vm462_vm2, %v442_v41 }
 0x143   :  { %1422 = verf.f32 %v371_v43  ;;  %1333 = vmatprep.mubr.msk.f32.mxu1 %vm1575_vm0, %v1576_v4 }
 0x144   :  { %v443_v47 = vmul.f32 %v418_v46, %v343_v44 }
 0x145   :  { %v1419_v48 = vpop.eup %1418 }
 0x146   :  { %v419_v50 = vadd.f32 1.0, %v1419_v48  ;;  %1334 = vmatmul.mubr.msk.f32.gmra.mrb[40].mxu1 %vm462_vm2, %v443_v47 }
 0x147   :  { %1336 = vmatprep.mubr.msk.f32.mxu1 %vm1575_vm0, %v1576_v4 }
 0x148   :  { %v444_v45 = vmul.f32 %v419_v50, %v344_v49 }
 0x149   :  { %v1421_v51 = vpop.eup %1420 }
 0x14a   :  { %v420_v53 = vadd.f32 1.0, %v1421_v51  ;;  %1337 = vmatmul.mubr.msk.f32.gmra.mrb[42].mxu1 %vm462_vm2, %v444_v45 }
 0x14b   :  { %1339 = vmatprep.mubr.msk.f32.mxu1 %vm1575_vm0, %v1576_v4 }
 0x14c   :  { %v445_v54 = vmul.f32 %v420_v53, %v345_v52 }
 0x14d   :  { %v1423_v55 = vpop.eup %1422 }
 0x14e   :  { %v421_v57 = vadd.f32 1.0, %v1423_v55  ;;  %1340 = vmatmul.mubr.msk.f32.gmra.mrb[44].mxu1 %vm462_vm2, %v445_v54 }
 0x14f   :  { %1342 = vmatprep.mubr.msk.f32.mxu1 %vm1575_vm0, %v1576_v4 }
 0x150   :  { %v446_v58 = vmul.f32 %v421_v57, %v346_v56 }
 0x152   :  { %1343 = vmatmul.mubr.msk.f32.gmra.mrb[46].mxu1 %vm462_vm2, %v446_v58 }
 0x1c5   :  { %v604_v60 = vpop.f32.mrb[50].mxu0 }
 0x1c6   :  { %v605_v61 = vadd.f32 %v1911_v59, %v604_v60  ;;  %v1272_v62 = vpop.f32.mrb[51].mxu0 }
 0x1c8   :  { %v753_v63 = vmul.f32 0.70710677, %v605_v61  ;;  %v728_v13 = vmul.f32 0.5, %v605_v61 }
 0x1c9   :  { %v609_v0 = vpop.f32.mrb[0].mxu1 }
 0x1ca   :  { %1424 = verf.f32 %v753_v63  ;;  %v610_v1 = vadd.f32 %v1911_v59, %v609_v0  ;;  %v1275_v2 = vpop.f32.mrb[1].mxu1 }
 0x1cc   :  { %v754_v3 = vmul.f32 0.70710677, %v610_v1  ;;  %v729_v22 = vmul.f32 0.5, %v610_v1 }
 0x1cd   :  { %v614_v4 = vpop.f32.mrb[2].mxu1 }
 0x1ce   :  { %1426 = verf.f32 %v754_v3  ;;  %v615_v5 = vadd.f32 %v1911_v59, %v614_v4  ;;  %v1278_v6 = vpop.f32.mrb[3].mxu1 }
 0x1d0   :  { %v755_v7 = vmul.f32 0.70710677, %v615_v5  ;;  %v730_v31 = vmul.f32 0.5, %v615_v5 }
 0x1d1   :  { %v619_v8 = vpop.f32.mrb[4].mxu1 }
 0x1d2   :  { %1428 = verf.f32 %v755_v7  ;;  %v620_v9 = vadd.f32 %v1911_v59, %v619_v8  ;;  %v1281_v10 = vpop.f32.mrb[5].mxu1 }
 0x1d4   :  { %v1425_v11 = vpop.eup %1424  ;;  %v756_v12 = vmul.f32 0.70710677, %v620_v9  ;;  %v731_v40 = vmul.f32 0.5, %v620_v9 }
 0x1d5   :  { %v803_v14 = vadd.f32 1.0, %v1425_v11  ;;  %v624_v15 = vpop.f32.mrb[6].mxu1 }
 0x1d6   :  { %1430 = verf.f32 %v756_v12  ;;  %v625_v16 = vadd.f32 %v1911_v59, %v624_v15  ;;  %v1284_v17 = vpop.f32.mrb[7].mxu1 }
 0x1d7   :  { %v828_v18 = vmul.f32 %v803_v14, %v728_v13 }
 0x1d8   :  { %v1427_v19 = vpop.eup %1426  ;;  %v757_v20 = vmul.f32 0.70710677, %v625_v16  ;;  %v732_v45 = vmul.f32 0.5, %v625_v16 }
 0x1d9   :  { %v1084_v21 = vmul.f32 -1.442695, %v828_v18  ;;  %v804_v23 = vadd.f32 1.0, %v1427_v19  ;;  %v629_v24 = vpop.f32.mrb[8].mxu1 }
 0x1da   :  { %1432 = verf.f32 %v757_v20  ;;  %v630_v25 = vadd.f32 %v1911_v59, %v629_v24  ;;  %v1287_v26 = vpop.f32.mrb[9].mxu1 }
 0x1db   :  { %1434 = vpow2.f32 %v1084_v21  ;;  %v829_v27 = vmul.f32 %v804_v23, %v729_v22 }
 0x1dc   :  { %v1429_v28 = vpop.eup %1428  ;;  %v758_v29 = vmul.f32 0.70710677, %v630_v25  ;;  %v733_v62 = vmul.f32 0.5, %v630_v25 }
 0x1dd   :  { %v1085_v30 = vmul.f32 -1.442695, %v829_v27  ;;  %v805_v32 = vadd.f32 1.0, %v1429_v28  ;;  %v634_v33 = vpop.f32.mrb[10].mxu1 }
 0x1de   :  { %1436 = verf.f32 %v758_v29  ;;  %v635_v34 = vadd.f32 %v1911_v59, %v634_v33  ;;  %v1290_v35 = vpop.f32.mrb[11].mxu1 }
 0x1df   :  { %1438 = vpow2.f32 %v1085_v30  ;;  %v830_v36 = vmul.f32 %v805_v32, %v730_v31 }
 0x1e0   :  { %v1431_v37 = vpop.eup %1430  ;;  %v759_v38 = vmul.f32 0.70710677, %v635_v34  ;;  %v734_v9 = vmul.f32 0.5, %v635_v34 }
 0x1e1   :  { %v1086_v39 = vmul.f32 -1.442695, %v830_v36  ;;  %v806_v41 = vadd.f32 1.0, %v1431_v37  ;;  %v639_v42 = vpop.f32.mrb[12].mxu1 }
 0x1e2   :  { %1440 = verf.f32 %v759_v38  ;;  %v640_v43 = vadd.f32 %v1911_v59, %v639_v42  ;;  %v1293_v44 = vpop.f32.mrb[13].mxu1 }
 0x1e3   :  { %1442 = vpow2.f32 %v1086_v39  ;;  %v831_v46 = vmul.f32 %v806_v41, %v731_v40 }
 0x1e4   :  { %v1433_v47 = vpop.eup %1432  ;;  %v760_v48 = vmul.f32 0.70710677, %v640_v43  ;;  %v735_v20 = vmul.f32 0.5, %v640_v43 }
 0x1e5   :  { %v1435_v49 = vpop.eup %1434  ;;  %v1087_v50 = vmul.f32 -1.442695, %v831_v46  ;;  %v807_v51 = vadd.f32 1.0, %v1433_v47  ;;  %v644_v52 = vpop.f32.mrb[14].mxu1 }
 0x1e6   :  { %v928_v53 = vadd.f32 1.0, %v1435_v49  ;;  %1444 = verf.f32 %v760_v48  ;;  %v645_v54 = vadd.f32 %v1911_v59, %v644_v52  ;;  %v1296_v55 = vpop.f32.mrb[15].mxu1 }
 0x1e7   :  { %1446 = vpow2.f32 %v1087_v50  ;;  %v832_v56 = vmul.f32 %v807_v51, %v732_v45 }
 0x1e8   :  { %v1437_v57 = vpop.eup %1436  ;;  %1448 = vrcp.f32 %v928_v53  ;;  %v761_v58 = vmul.f32 0.70710677, %v645_v54  ;;  %v736_v32 = vmul.f32 0.5, %v645_v54 }
 0x1e9   :  { %v1439_v60 = vpop.eup %1438  ;;  %v1088_v61 = vmul.f32 -1.442695, %v832_v56  ;;  %v808_v63 = vadd.f32 1.0, %v1437_v57  ;;  %v649_v0 = vpop.f32.mrb[16].mxu1 }
 0x1ea   :  { %v929_v1 = vadd.f32 1.0, %v1439_v60  ;;  %1450 = verf.f32 %v761_v58  ;;  %v650_v2 = vadd.f32 %v1911_v59, %v649_v0  ;;  %v1299_v3 = vpop.f32.mrb[17].mxu1 }
 0x1eb   :  { %1452 = vpow2.f32 %v1088_v61  ;;  %v833_v4 = vmul.f32 %v808_v63, %v733_v62 }
 0x1ec   :  { %v1441_v5 = vpop.eup %1440  ;;  %1454 = vrcp.f32 %v929_v1  ;;  %v762_v6 = vmul.f32 0.70710677, %v650_v2  ;;  %v737_v44 = vmul.f32 0.5, %v650_v2 }
 0x1ed   :  { %v1443_v7 = vpop.eup %1442  ;;  %v1089_v8 = vmul.f32 -1.442695, %v833_v4  ;;  %v809_v10 = vadd.f32 1.0, %v1441_v5  ;;  %v654_v11 = vpop.f32.mrb[18].mxu1 }
 0x1ee   :  { %v930_v12 = vadd.f32 1.0, %v1443_v7  ;;  %1456 = verf.f32 %v762_v6  ;;  %v655_v13 = vadd.f32 %v1911_v59, %v654_v11  ;;  %v1302_v14 = vpop.f32.mrb[19].mxu1 }
 0x1ef   :  { %1458 = vpow2.f32 %v1089_v8  ;;  %v834_v15 = vmul.f32 %v809_v10, %v734_v9 }
 0x1f0   :  { %v1445_v16 = vpop.eup %1444  ;;  %1460 = vrcp.f32 %v930_v12  ;;  %v763_v17 = vmul.f32 0.70710677, %v655_v13  ;;  %v738_v56 = vmul.f32 0.5, %v655_v13 }
 0x1f1   :  { %v1447_v18 = vpop.eup %1446  ;;  %v1090_v19 = vmul.f32 -1.442695, %v834_v15  ;;  %v810_v21 = vadd.f32 1.0, %v1445_v16  ;;  %v659_v22 = vpop.f32.mrb[20].mxu1 }
 0x1f2   :  { %v1449_v23 = vpop.eup %1448  ;;  %v931_v24 = vadd.f32 1.0, %v1447_v18  ;;  %1462 = verf.f32 %v763_v17  ;;  %v660_v25 = vadd.f32 %v1911_v59, %v659_v22  ;;  %v1305_v26 = vpop.f32.mrb[21].mxu1 }
 0x1f3   :  { %1003 = vst.msk [vmem:[%s2043_s5] sm:$0xff] %vm56_vm1, %v1449_v23  ;;  %1464 = vpow2.f32 %v1090_v19  ;;  %v835_v27 = vmul.f32 %v810_v21, %v735_v20 }
 0x1f4   :  { %v1451_v28 = vpop.eup %1450  ;;  %1466 = vrcp.f32 %v931_v24  ;;  %v764_v29 = vmul.f32 0.70710677, %v660_v25  ;;  %v739_v5 = vmul.f32 0.5, %v660_v25 }
 0x1f5   :  { %v1453_v30 = vpop.eup %1452  ;;  %v1091_v31 = vmul.f32 -1.442695, %v835_v27  ;;  %v811_v33 = vadd.f32 1.0, %v1451_v28  ;;  %v664_v34 = vpop.f32.mrb[22].mxu1 }
 0x1f6   :  { %v1455_v35 = vpop.eup %1454  ;;  %v932_v36 = vadd.f32 1.0, %v1453_v30  ;;  %1468 = verf.f32 %v764_v29  ;;  %v665_v37 = vadd.f32 %v1911_v59, %v664_v34  ;;  %v1308_v38 = vpop.f32.mrb[23].mxu1 }
 0x1f7   :  { %1004 = vst.msk [vmem:[%s2043_s5 + $0x8] sm:$0xff] %vm56_vm1, %v1455_v35  ;;  %1470 = vpow2.f32 %v1091_v31  ;;  %v836_v39 = vmul.f32 %v811_v33, %v736_v32 }
 0x1f8   :  { %v1457_v40 = vpop.eup %1456  ;;  %1472 = vrcp.f32 %v932_v36  ;;  %v765_v41 = vmul.f32 0.70710677, %v665_v37  ;;  %v740_v17 = vmul.f32 0.5, %v665_v37 }
 0x1f9   :  { %v1459_v42 = vpop.eup %1458  ;;  %v1092_v43 = vmul.f32 -1.442695, %v836_v39  ;;  %v812_v46 = vadd.f32 1.0, %v1457_v40  ;;  %v669_v47 = vpop.f32.mrb[24].mxu1 }
 0x1fa   :  { %v1461_v48 = vpop.eup %1460  ;;  %v933_v49 = vadd.f32 1.0, %v1459_v42  ;;  %1474 = verf.f32 %v765_v41  ;;  %v670_v50 = vadd.f32 %v1911_v59, %v669_v47  ;;  %v1311_v45 = vpop.f32.mrb[25].mxu1 }
 0x1fb   :  { %1005 = vst.msk [vmem:[%s2043_s5 + $0x10] sm:$0xff] %vm56_vm1, %v1461_v48  ;;  %1476 = vpow2.f32 %v1092_v43  ;;  %v837_v51 = vmul.f32 %v812_v46, %v737_v44 }
 0x1fc   :  { %v1463_v52 = vpop.eup %1462  ;;  %1478 = vrcp.f32 %v933_v49  ;;  %v766_v53 = vmul.f32 0.70710677, %v670_v50  ;;  %v741_v29 = vmul.f32 0.5, %v670_v50 }
 0x1fd   :  { %v1465_v54 = vpop.eup %1464  ;;  %v1093_v55 = vmul.f32 -1.442695, %v837_v51  ;;  %v813_v57 = vadd.f32 1.0, %v1463_v52  ;;  %v674_v58 = vpop.f32.mrb[26].mxu1 }
 0x1fe   :  { %v1467_v60 = vpop.eup %1466  ;;  %v934_v61 = vadd.f32 1.0, %v1465_v54  ;;  %1480 = verf.f32 %v766_v53  ;;  %v675_v62 = vadd.f32 %v1911_v59, %v674_v58  ;;  %v1314_v63 = vpop.f32.mrb[27].mxu1 }
 0x1ff   :  { %1006 = vst.msk [vmem:[%s2043_s5 + $0x18] sm:$0xff] %vm56_vm1, %v1467_v60  ;;  %1482 = vpow2.f32 %v1093_v55  ;;  %v838_v0 = vmul.f32 %v813_v57, %v738_v56 }
 0x200   :  { %v1469_v1 = vpop.eup %1468  ;;  %1484 = vrcp.f32 %v934_v61  ;;  %v767_v2 = vmul.f32 0.70710677, %v675_v62  ;;  %v742_v41 = vmul.f32 0.5, %v675_v62 }
 0x201   :  { %v1471_v3 = vpop.eup %1470  ;;  %v1094_v4 = vmul.f32 -1.442695, %v838_v0  ;;  %v814_v6 = vadd.f32 1.0, %v1469_v1  ;;  %v679_v7 = vpop.f32.mrb[28].mxu1 }
 0x202   :  { %v1473_v8 = vpop.eup %1472  ;;  %v935_v9 = vadd.f32 1.0, %v1471_v3  ;;  %1486 = verf.f32 %v767_v2  ;;  %v680_v10 = vadd.f32 %v1911_v59, %v679_v7  ;;  %v1317_v11 = vpop.f32.mrb[29].mxu1 }
 0x203   :  { %1007 = vst.msk [vmem:[%s2043_s5 + $0x20] sm:$0xff] %vm56_vm1, %v1473_v8  ;;  %1488 = vpow2.f32 %v1094_v4  ;;  %v839_v12 = vmul.f32 %v814_v6, %v739_v5 }
 0x204   :  { %v1475_v13 = vpop.eup %1474  ;;  %1490 = vrcp.f32 %v935_v9  ;;  %v768_v14 = vmul.f32 0.70710677, %v680_v10  ;;  %v743_v53 = vmul.f32 0.5, %v680_v10 }
 0x205   :  { %v1477_v15 = vpop.eup %1476  ;;  %v1095_v16 = vmul.f32 -1.442695, %v839_v12  ;;  %v815_v18 = vadd.f32 1.0, %v1475_v13  ;;  %v684_v19 = vpop.f32.mrb[30].mxu1 }
 0x206   :  { %v1479_v20 = vpop.eup %1478  ;;  %v936_v21 = vadd.f32 1.0, %v1477_v15  ;;  %1492 = verf.f32 %v768_v14  ;;  %v685_v22 = vadd.f32 %v1911_v59, %v684_v19  ;;  %v1320_v23 = vpop.f32.mrb[31].mxu1 }
 0x207   :  { %1008 = vst.msk [vmem:[%s2043_s5 + $0x28] sm:$0xff] %vm56_vm1, %v1479_v20  ;;  %1494 = vpow2.f32 %v1095_v16  ;;  %v840_v24 = vmul.f32 %v815_v18, %v740_v17 }
 0x208   :  { %v1481_v25 = vpop.eup %1480  ;;  %1496 = vrcp.f32 %v936_v21  ;;  %v769_v26 = vmul.f32 0.70710677, %v685_v22  ;;  %v744_v2 = vmul.f32 0.5, %v685_v22 }
 0x209   :  { %v1483_v27 = vpop.eup %1482  ;;  %v1096_v28 = vmul.f32 -1.442695, %v840_v24  ;;  %v816_v30 = vadd.f32 1.0, %v1481_v25  ;;  %v689_v31 = vpop.f32.mrb[32].mxu1 }
 0x20a   :  { %v1485_v32 = vpop.eup %1484  ;;  %v937_v33 = vadd.f32 1.0, %v1483_v27  ;;  %1498 = verf.f32 %v769_v26  ;;  %v690_v34 = vadd.f32 %v1911_v59, %v689_v31  ;;  %v1323_v35 = vpop.f32.mrb[33].mxu1 }
 0x20b   :  { %1009 = vst.msk [vmem:[%s2043_s5 + $0x30] sm:$0xff] %vm56_vm1, %v1485_v32  ;;  %1500 = vpow2.f32 %v1096_v28  ;;  %v841_v36 = vmul.f32 %v816_v30, %v741_v29 }
 0x20c   :  { %v1487_v37 = vpop.eup %1486  ;;  %1502 = vrcp.f32 %v937_v33  ;;  %v770_v38 = vmul.f32 0.70710677, %v690_v34  ;;  %v745_v14 = vmul.f32 0.5, %v690_v34 }
 0x20d   :  { %v1489_v39 = vpop.eup %1488  ;;  %v1097_v40 = vmul.f32 -1.442695, %v841_v36  ;;  %v817_v42 = vadd.f32 1.0, %v1487_v37  ;;  %v694_v43 = vpop.f32.mrb[34].mxu1 }
 0x20e   :  { %v1491_v44 = vpop.eup %1490  ;;  %v938_v46 = vadd.f32 1.0, %v1489_v39  ;;  %1504 = verf.f32 %v770_v38  ;;  %v695_v47 = vadd.f32 %v1911_v59, %v694_v43  ;;  %v1326_v48 = vpop.f32.mrb[35].mxu1 }
 0x20f   :  { %1010 = vst.msk [vmem:[%s2043_s5 + $0x38] sm:$0xff] %vm56_vm1, %v1491_v44  ;;  %1506 = vpow2.f32 %v1097_v40  ;;  %v842_v49 = vmul.f32 %v817_v42, %v742_v41 }
 0x210   :  { %v1493_v50 = vpop.eup %1492  ;;  %1508 = vrcp.f32 %v938_v46  ;;  %v771_v45 = vmul.f32 0.70710677, %v695_v47  ;;  %v746_v26 = vmul.f32 0.5, %v695_v47 }
 0x211   :  { %v1495_v51 = vpop.eup %1494  ;;  %v1098_v52 = vmul.f32 -1.442695, %v842_v49  ;;  %v818_v54 = vadd.f32 1.0, %v1493_v50  ;;  %v699_v55 = vpop.f32.mrb[36].mxu1 }
 0x212   :  { %v1497_v56 = vpop.eup %1496  ;;  %v939_v57 = vadd.f32 1.0, %v1495_v51  ;;  %1510 = verf.f32 %v771_v45  ;;  %v700_v58 = vadd.f32 %v1911_v59, %v699_v55  ;;  %v1329_v60 = vpop.f32.mrb[37].mxu1 }
 0x213   :  { %1011 = vst.msk [vmem:[%s2043_s5 + $0x40] sm:$0xff] %vm56_vm1, %v1497_v56  ;;  %1512 = vpow2.f32 %v1098_v52  ;;  %v843_v61 = vmul.f32 %v818_v54, %v743_v53 }
 0x214   :  { %v1499_v62 = vpop.eup %1498  ;;  %1514 = vrcp.f32 %v939_v57  ;;  %v772_v63 = vmul.f32 0.70710677, %v700_v58  ;;  %v747_v38 = vmul.f32 0.5, %v700_v58 }
 0x215   :  { %v1501_v0 = vpop.eup %1500  ;;  %v1099_v1 = vmul.f32 -1.442695, %v843_v61  ;;  %v819_v3 = vadd.f32 1.0, %v1499_v62  ;;  %v704_v4 = vpop.f32.mrb[38].mxu1 }
 0x216   :  { %v1503_v5 = vpop.eup %1502  ;;  %v940_v6 = vadd.f32 1.0, %v1501_v0  ;;  %1516 = verf.f32 %v772_v63  ;;  %v705_v7 = vadd.f32 %v1911_v59, %v704_v4  ;;  %v1332_v8 = vpop.f32.mrb[39].mxu1 }
 0x217   :  { %1012 = vst.msk [vmem:[%s2043_s5 + $0x48] sm:$0xff] %vm56_vm1, %v1503_v5  ;;  %1518 = vpow2.f32 %v1099_v1  ;;  %v844_v9 = vmul.f32 %v819_v3, %v744_v2 }
 0x218   :  { %v1505_v10 = vpop.eup %1504  ;;  %1520 = vrcp.f32 %v940_v6  ;;  %v773_v11 = vmul.f32 0.70710677, %v705_v7  ;;  %v748_v45 = vmul.f32 0.5, %v705_v7 }
 0x219   :  { %v1507_v12 = vpop.eup %1506  ;;  %v1100_v13 = vmul.f32 -1.442695, %v844_v9  ;;  %v820_v15 = vadd.f32 1.0, %v1505_v10  ;;  %v709_v16 = vpop.f32.mrb[40].mxu1 }
 0x21a   :  { %v1509_v17 = vpop.eup %1508  ;;  %v941_v18 = vadd.f32 1.0, %v1507_v12  ;;  %1522 = verf.f32 %v773_v11  ;;  %v710_v19 = vadd.f32 %v1911_v59, %v709_v16  ;;  %v1335_v20 = vpop.f32.mrb[41].mxu1 }
 0x21b   :  { %1013 = vst.msk [vmem:[%s2043_s5 + $0x50] sm:$0xff] %vm56_vm1, %v1509_v17  ;;  %1524 = vpow2.f32 %v1100_v13  ;;  %v845_v21 = vmul.f32 %v820_v15, %v745_v14 }
 0x21c   :  { %v1511_v22 = vpop.eup %1510  ;;  %1526 = vrcp.f32 %v941_v18  ;;  %v774_v23 = vmul.f32 0.70710677, %v710_v19  ;;  %v749_v63 = vmul.f32 0.5, %v710_v19 }
 0x21d   :  { %v1513_v24 = vpop.eup %1512  ;;  %v1101_v25 = vmul.f32 -1.442695, %v845_v21  ;;  %v821_v27 = vadd.f32 1.0, %v1511_v22  ;;  %v714_v28 = vpop.f32.mrb[42].mxu1 }
 0x21e   :  { %v1515_v29 = vpop.eup %1514  ;;  %v942_v30 = vadd.f32 1.0, %v1513_v24  ;;  %1528 = verf.f32 %v774_v23  ;;  %v715_v31 = vadd.f32 %v1911_v59, %v714_v28  ;;  %v1338_v32 = vpop.f32.mrb[43].mxu1 }
 0x21f   :  { %1014 = vst.msk [vmem:[%s2043_s5 + $0x58] sm:$0xff] %vm56_vm1, %v1515_v29  ;;  %1530 = vpow2.f32 %v1101_v25  ;;  %v846_v33 = vmul.f32 %v821_v27, %v746_v26 }
 0x220   :  { %v1517_v34 = vpop.eup %1516  ;;  %1532 = vrcp.f32 %v942_v30  ;;  %v775_v35 = vmul.f32 0.70710677, %v715_v31  ;;  %v750_v6 = vmul.f32 0.5, %v715_v31 }
 0x221   :  { %v1519_v36 = vpop.eup %1518  ;;  %v1102_v37 = vmul.f32 -1.442695, %v846_v33  ;;  %v822_v39 = vadd.f32 1.0, %v1517_v34  ;;  %v719_v40 = vpop.f32.mrb[44].mxu1 }
 0x222   :  { %v1521_v41 = vpop.eup %1520  ;;  %v943_v42 = vadd.f32 1.0, %v1519_v36  ;;  %1534 = verf.f32 %v775_v35  ;;  %v720_v43 = vadd.f32 %v1911_v59, %v719_v40  ;;  %v1341_v44 = vpop.f32.mrb[45].mxu1 }
 0x223   :  { %1015 = vst.msk [vmem:[%s2043_s5 + $0x60] sm:$0xff] %vm56_vm1, %v1521_v41  ;;  %1536 = vpow2.f32 %v1102_v37  ;;  %v847_v46 = vmul.f32 %v822_v39, %v747_v38 }
 0x224   :  { %v1523_v47 = vpop.eup %1522  ;;  %1538 = vrcp.f32 %v943_v42  ;;  %v776_v48 = vmul.f32 0.70710677, %v720_v43  ;;  %v751_v14 = vmul.f32 0.5, %v720_v43 }
 0x225   :  { %v1525_v49 = vpop.eup %1524  ;;  %v1103_v50 = vmul.f32 -1.442695, %v847_v46  ;;  %v823_v51 = vadd.f32 1.0, %v1523_v47  ;;  %v724_v52 = vpop.f32.mrb[46].mxu1 }
 0x226   :  { %v1527_v53 = vpop.eup %1526  ;;  %v944_v54 = vadd.f32 1.0, %v1525_v49  ;;  %1540 = verf.f32 %v776_v48  ;;  %v725_v55 = vadd.f32 %v1911_v59, %v724_v52  ;;  %v1344_v56 = vpop.f32.mrb[47].mxu1 }
 0x227   :  { %1016 = vst.msk [vmem:[%s2043_s5 + $0x68] sm:$0xff] %vm56_vm1, %v1527_v53  ;;  %1542 = vpow2.f32 %v1103_v50  ;;  %v848_v57 = vmul.f32 %v823_v51, %v748_v45 }
 0x228   :  { %v1529_v58 = vpop.eup %1528  ;;  %1544 = vrcp.f32 %v944_v54  ;;  %v777_v60 = vmul.f32 0.70710677, %v725_v55  ;;  %v752_v22 = vmul.f32 0.5, %v725_v55 }
 0x229   :  { %v1531_v61 = vpop.eup %1530  ;;  %v1104_v62 = vmul.f32 -1.442695, %v848_v57  ;;  %v824_v0 = vadd.f32 1.0, %v1529_v58 }
 0x22a   :  { %v1533_v1 = vpop.eup %1532  ;;  %v945_v2 = vadd.f32 1.0, %v1531_v61  ;;  %1546 = verf.f32 %v777_v60 }
 0x22b   :  { %1017 = vst.msk [vmem:[%s2043_s5 + $0x70] sm:$0xff] %vm56_vm1, %v1533_v1  ;;  %1548 = vpow2.f32 %v1104_v62  ;;  %v849_v59 = vmul.f32 %v824_v0, %v749_v63 }
 0x22c   :  { %v1535_v3 = vpop.eup %1534  ;;  %1550 = vrcp.f32 %v945_v2 }
 0x22d   :  { %v1537_v4 = vpop.eup %1536  ;;  %v1105_v5 = vmul.f32 -1.442695, %v849_v59  ;;  %v825_v7 = vadd.f32 1.0, %v1535_v3 }
 0x22e   :  { %v1539_v8 = vpop.eup %1538  ;;  %v946_v9 = vadd.f32 1.0, %v1537_v4 }
 0x22f   :  { %1018 = vst.msk [vmem:[%s2043_s5 + $0x78] sm:$0xff] %vm56_vm1, %v1539_v8  ;;  %1552 = vpow2.f32 %v1105_v5  ;;  %v850_v10 = vmul.f32 %v825_v7, %v750_v6 }
 0x230   :  { %v1541_v11 = vpop.eup %1540  ;;  %1554 = vrcp.f32 %v946_v9 }
 0x231   :  { %v1543_v12 = vpop.eup %1542  ;;  %v1106_v13 = vmul.f32 -1.442695, %v850_v10  ;;  %v826_v15 = vadd.f32 1.0, %v1541_v11 }
 0x232   :  { %v1545_v16 = vpop.eup %1544  ;;  %v947_v17 = vadd.f32 1.0, %v1543_v12 }
 0x233   :  { %1019 = vst.msk [vmem:[%s2043_s5 + $0x80] sm:$0xff] %vm56_vm1, %v1545_v16  ;;  %1556 = vpow2.f32 %v1106_v13  ;;  %v851_v18 = vmul.f32 %v826_v15, %v751_v14 }
 0x234   :  { %v1547_v19 = vpop.eup %1546  ;;  %1558 = vrcp.f32 %v947_v17 }
 0x235   :  { %v1549_v20 = vpop.eup %1548  ;;  %v1107_v21 = vmul.f32 -1.442695, %v851_v18  ;;  %v827_v23 = vadd.f32 1.0, %v1547_v19 }
 0x236   :  { %v1551_v24 = vpop.eup %1550  ;;  %v948_v25 = vadd.f32 1.0, %v1549_v20 }
 0x237   :  { %1020 = vst.msk [vmem:[%s2043_s5 + $0x88] sm:$0xff] %vm56_vm1, %v1551_v24  ;;  %1560 = vpow2.f32 %v1107_v21  ;;  %v852_v26 = vmul.f32 %v827_v23, %v752_v22 }
 0x238   :  { %1562 = vrcp.f32 %v948_v25 }
 0x239   :  { %v1553_v27 = vpop.eup %1552  ;;  %v1108_v28 = vmul.f32 -1.442695, %v852_v26 }
 0x23a   :  { %v1555_v29 = vpop.eup %1554  ;;  %v949_v30 = vadd.f32 1.0, %v1553_v27 }
 0x23b   :  { %1021 = vst.msk [vmem:[%s2043_s5 + $0x90] sm:$0xff] %vm56_vm1, %v1555_v29  ;;  %1564 = vpow2.f32 %v1108_v28 }
 0x23c   :  { %1566 = vrcp.f32 %v949_v30 }
 0x23d   :  { %v1557_v31 = vpop.eup %1556 }
 0x23e   :  { %v1559_v32 = vpop.eup %1558  ;;  %v950_v33 = vadd.f32 1.0, %v1557_v31 }
 0x23f   :  { %1022 = vst.msk [vmem:[%s2043_s5 + $0x98] sm:$0xff] %vm56_vm1, %v1559_v32 }
 0x240   :  { %1568 = vrcp.f32 %v950_v33 }
 0x241   :  { %v1561_v34 = vpop.eup %1560 }
 0x242   :  { %v1563_v35 = vpop.eup %1562  ;;  %v951_v36 = vadd.f32 1.0, %v1561_v34 }
 0x243   :  { %1023 = vst.msk [vmem:[%s2043_s5 + $0xa0] sm:$0xff] %vm56_vm1, %v1563_v35 }
 0x244   :  { %1570 = vrcp.f32 %v951_v36 }
 0x245   :  { %v1565_v37 = vpop.eup %1564 }
 0x246   :  { %v1567_v38 = vpop.eup %1566  ;;  %v952_v39 = vadd.f32 1.0, %v1565_v37 }
 0x247   :  { %1024 = vst.msk [vmem:[%s2043_s5 + $0xa8] sm:$0xff] %vm56_vm1, %v1567_v38 }
 0x248   :  { %1572 = vrcp.f32 %v952_v39 }
 0x24a   :  { %v1569_v40 = vpop.eup %1568 }
 0x24b   :  { %1025 = vst.msk [vmem:[%s2043_s5 + $0xb0] sm:$0xff] %vm56_vm1, %v1569_v40 }
 0x24e   :  { %v1571_v41 = vpop.eup %1570 }
 0x24f   :  { %1026 = vst.msk [vmem:[%s2043_s5 + $0xb8] sm:$0xff] %vm56_vm1, %v1571_v41 }
 0x252   :  { %v1573_v42 = vpop.eup %1572 }
 0x253   :  { %1027 = vst.msk [vmem:[%s2043_s5 + $0xc0] sm:$0xff] %vm56_vm1, %v1573_v42 }

</bundles_post_ra>
